<compile_context>
chip_gen: v7x
topology: tpu7x:2x2x1
jax: 0.10.0
libtpu: 0.0.40
codegen_flags: <defaults>
</compile_context>

<pallas_src>
import functools

import numpy as np

import jax
import jax.numpy as jnp
from jax import lax
from jax.experimental import pallas as pl
from jax.experimental.pallas import tpu as pltpu


# ----------------------------------------------------------------------------
# In-kernel color helpers (shared by the jitter and gray-partials kernels)
# ----------------------------------------------------------------------------

def _rgb_to_gray(r, g, b):
    # torchvision rgb_to_grayscale weights
    return 0.2989 * r + 0.587 * g + 0.114 * b


def _sel3(cond, new, old):
    """Select a whole (r, g, b) tuple with a scalar predicate (cheap ops only)."""
    return tuple(jnp.where(cond, n, o) for n, o in zip(new, old))


def _brightness(rgb, f):
    return tuple(jnp.clip(c * f, 0.0, 1.0) for c in rgb)


def _contrast(rgb, f, mean):
    return tuple(jnp.clip(f * c + (1.0 - f) * mean, 0.0, 1.0) for c in rgb)


def _saturation(rgb, f):
    gray = _rgb_to_gray(*rgb)
    return tuple(jnp.clip(f * c + (1.0 - f) * gray, 0.0, 1.0) for c in rgb)


def _hue(rgb, delta):
    """adjust_hue: RGB -> HSV, shift h, HSV -> RGB.  Exact divides (parity with
    torch); branch-free HSV->RGB (equivalent to torchvision's sextant table)."""
    r, g, b = rgb
    maxc = jnp.maximum(jnp.maximum(r, g), b)
    minc = jnp.minimum(jnp.minimum(r, g), b)
    eqc = maxc == minc
    cr = maxc - minc
    ones = jnp.ones_like(maxc)
    s = cr / jnp.where(eqc, ones, maxc)
    inv_cr = 1.0 / jnp.where(eqc, ones, cr)
    rc = (maxc - r) * inv_cr
    gc = (maxc - g) * inv_cr
    bc = (maxc - b) * inv_cr
    hr = jnp.where(maxc == r, bc - gc, 0.0)
    hg = jnp.where((maxc == g) & (maxc != r), 2.0 + rc - bc, 0.0)
    hb = jnp.where((maxc != g) & (maxc != r), 4.0 + gc - rc, 0.0)
    h = (hr + hg + hb) * (1.0 / 6.0) + 1.0
    h = h - jnp.floor(h)                 # fmod(., 1.0) for positive vals
    h = h + delta                        # hue shift
    h = h - jnp.floor(h)                 # (h + delta) % 1.0
    v = maxc
    h6 = h * 6.0

    def chan(n):
        k = n + h6                       # in [n, n+6)
        k = k - jnp.where(k >= 6.0, 6.0, 0.0)
        w = jnp.clip(jnp.minimum(k, 4.0 - k), 0.0, 1.0)
        return jnp.clip(v - v * s * w, 0.0, 1.0)

    return (chan(5.0), chan(3.0), chan(1.0))


# ----------------------------------------------------------------------------
# Pallas kernels
# ----------------------------------------------------------------------------
# Scalar layout (SMEM, runtime inputs -> no recompilation across random draws):
#   flags  (int32[8]): [apply_brightness, contrast_in_slot1, apply_saturation,
#                       apply_hue, contrast_in_slot2, 0, 0, 0]
#   factors(f32 [8]) : [b_factor, c_factor, s_factor, h_delta, gray_mean, 0,0,0]

def _color_jitter_kernel(flags_ref, fac_ref, img_ref, out_ref):
    ab = flags_ref[0] > 0
    c1 = flags_ref[1] > 0
    asat = flags_ref[2] > 0
    ahue = flags_ref[3] > 0
    c2 = flags_ref[4] > 0
    bf = fac_ref[0]
    cf = fac_ref[1]
    sf = fac_ref[2]
    hd = fac_ref[3]
    mean = fac_ref[4]

    rgb = (img_ref[0, :, :], img_ref[1, :, :], img_ref[2, :, :])
    rgb = _sel3(ab, _brightness(rgb, bf), rgb)
    rgb = _sel3(c1, _contrast(rgb, cf, mean), rgb)       # contrast-first slot
    rgb = _sel3(asat, _saturation(rgb, sf), rgb)

    def _finish(r, g, b):
        r, g, b = _sel3(c2, _contrast((r, g, b), cf, mean), (r, g, b))
        out_ref[0, :, :] = r
        out_ref[1, :, :] = g
        out_ref[2, :, :] = b

    # Hue is the expensive path: gate it with pl.when so draws without hue
    # skip the RGB<->HSV work entirely instead of computing it and selecting.
    @pl.when(ahue)
    def _hue_branch():
        _finish(*_hue(rgb, hd))

    @pl.when(jnp.logical_not(ahue))
    def _no_hue_branch():
        _finish(*rgb)


def _gray_partials_kernel(h_total, flags_ref, fac_ref, img_ref, out_ref):
    """Per-grid-step partial sums of the grayscale of the image *as seen by
    adjust_contrast* (after brightness, and after sat/hue iff contrast is in
    the second slot).  Each step writes its own (8, W) output block (parallel
    semantics -> both TCs on v7x); only row 0 carries the sublane-reduced
    partial sum, the tiny final reduce happens in JAX."""
    ab = flags_ref[0] > 0
    c2 = flags_ref[4] > 0
    pre_s = (flags_ref[2] > 0) & c2
    pre_h = (flags_ref[3] > 0) & c2
    bf = fac_ref[0]
    sf = fac_ref[2]
    hd = fac_ref[3]

    th, w = img_ref.shape[1], img_ref.shape[2]
    i = pl.program_id(0)
    row = lax.broadcasted_iota(jnp.int32, (th, w), 0)
    valid = (row + i * th) < h_total        # mask the partial last row-tile

    rgb = (img_ref[0, :, :], img_ref[1, :, :], img_ref[2, :, :])
    rgb = _sel3(ab, _brightness(rgb, bf), rgb)
    rgb = _sel3(pre_s, _saturation(rgb, sf), rgb)

    def _store(r, g, b):
        gray = jnp.where(valid, _rgb_to_gray(r, g, b), 0.0)
        out_ref[...] = jnp.zeros_like(out_ref)
        out_ref[0:1, :] = jnp.sum(gray, axis=0, keepdims=True)  # sublane-only

    @pl.when(pre_h)
    def _hue_branch():
        _store(*_hue(rgb, hd))

    @pl.when(jnp.logical_not(pre_h))
    def _no_hue_branch():
        _store(*rgb)


def _mask_sums_kernel(h_total, m_ref, out_ref):
    """(m_tile, th, W) int8 mask tile -> per-mask sums accumulated in (m_tile, 1).
    Grid axes: (mask blocks [parallel], row blocks [arbitrary/resident])."""
    j = pl.program_id(1)

    @pl.when(j == 0)
    def _init():
        out_ref[...] = jnp.zeros_like(out_ref)

    th, w = m_ref.shape[1], m_ref.shape[2]
    row = lax.broadcasted_iota(jnp.int32, (th, w), 0)
    valid = (row + j * th) < h_total
    m = jnp.where(valid, m_ref[...].astype(jnp.float32), 0.0)
    out_ref[...] += jnp.sum(jnp.sum(m, axis=2), axis=1, keepdims=True)


# ----------------------------------------------------------------------------
# Tiling helpers + jitted Pallas wrappers (no repacking; direct (C,H,W) tiles)
# ----------------------------------------------------------------------------

_TILE_BYTES = 4 << 20    # per input tile; BlockSpec double-buffers -> ~16 MiB
                         # for in+out on the jitter pass, fine on all gens.
_VMEM_LIMIT = 32 << 20   # explicit: v5e's scoped-VMEM default is only 16 MiB.


def _row_tile(c, h, w, itemsize=4):
    """Largest row-tile (multiple of 8, or full h) whose (c, th, w) block fits
    the budget; bigger tiles amortize the ~0.35us per-grid-step overhead."""
    if c * h * w * itemsize <= _TILE_BYTES or h <= 8:
        return h
    th = (_TILE_BYTES // (c * w * itemsize)) // 8 * 8
    return int(max(8, min(th, h)))


def _jitter_pallas(flags, factors, img, th):
    c, h, w = img.shape
    grid = pl.cdiv(h, th)
    return pl.pallas_call(
        _color_jitter_kernel,
        out_shape=jax.ShapeDtypeStruct((c, h, w), jnp.float32),
        grid_spec=pltpu.PrefetchScalarGridSpec(
            num_scalar_prefetch=2,
            grid=(grid,),
            in_specs=[pl.BlockSpec((c, th, w), lambda i, fl, fa: (0, i, 0))],
            out_specs=pl.BlockSpec((c, th, w), lambda i, fl, fa: (0, i, 0)),
        ),
        compiler_params=pltpu.CompilerParams(
            dimension_semantics=("parallel",),
            vmem_limit_bytes=_VMEM_LIMIT),
    )(flags, factors, img)


@jax.jit
def _color_jitter_call(flags, factors, img):
    """Color jitter when contrast is NOT applied (no gray-mean pass needed)."""
    c, h, w = img.shape
    return _jitter_pallas(flags, factors, img, _row_tile(c, h, w))


@jax.jit
def _color_jitter_with_mean_call(flags, factors, img):
    """Gray-mean reduction + jitter in ONE jit: both pallas_calls read the
    image directly in its (C, H, W) layout (no repack copies) and the mean is
    threaded to the jitter kernel as a device scalar in the SMEM factors."""
    c, h, w = img.shape
    th = _row_tile(c, h, w)
    grid = pl.cdiv(h, th)
    partials = pl.pallas_call(
        functools.partial(_gray_partials_kernel, h),
        out_shape=jax.ShapeDtypeStruct((grid * 8, w), jnp.float32),
        grid_spec=pltpu.PrefetchScalarGridSpec(
            num_scalar_prefetch=2,
            grid=(grid,),
            in_specs=[pl.BlockSpec((c, th, w), lambda i, fl, fa: (0, i, 0))],
            out_specs=pl.BlockSpec((8, w), lambda i, fl, fa: (i, 0)),
        ),
        compiler_params=pltpu.CompilerParams(
            dimension_semantics=("parallel",),
            vmem_limit_bytes=_VMEM_LIMIT),
    )(flags, factors, img)
    mean = jnp.sum(partials) / jnp.float32(h * w)
    factors = factors.at[4].set(mean)
    return _jitter_pallas(flags, factors, img, th)


@jax.jit
def _mask_sums_call(masks_bool):
    m, h, w = masks_bool.shape
    m_tile = 8                                   # VMEM footprint decoupled from M
    m_pad = ((m + m_tile - 1) // m_tile) * m_tile
    th = _row_tile(m_tile, h, w, itemsize=1)
    # TODO(synk): feed the bool masks directly once Mosaic i1 I/O is reliable;
    # the int8 cast is a same-size copy of the small post-crop tensor.
    x = masks_bool.astype(jnp.int8)
    if m_pad != m:
        x = jnp.pad(x, ((0, m_pad - m), (0, 0), (0, 0)))
    sums = pl.pallas_call(
        functools.partial(_mask_sums_kernel, h),
        out_shape=jax.ShapeDtypeStruct((m_pad, 1), jnp.float32),
        grid=(m_pad // m_tile, pl.cdiv(h, th)),
        in_specs=[pl.BlockSpec((m_tile, th, w), lambda i, j: (i, j, 0))],
        out_specs=pl.BlockSpec((m_tile, 1), lambda i, j: (i, 0)),
        compiler_params=pltpu.CompilerParams(
            dimension_semantics=("parallel", "arbitrary"),
            vmem_limit_bytes=_VMEM_LIMIT),
    )(x)
    return sums[:m, 0]


# ----------------------------------------------------------------------------
# Transforms.forward (JAX glue around the kernels)
# ----------------------------------------------------------------------------

def _lerp(u, lo, hi):
    return float(lo + float(u) * (hi - lo))


def transforms_forward(img, target, key, cfg):
    """One attempt of Transforms.forward. Returns None if all masks end up empty
    (the torch reference recurses; the caller retries with a new key)."""
    img_size = cfg["img_size"]

    # Batch ALL random draws into a single host sync.
    u = np.asarray(jax.device_get(jax.random.uniform(key, (16,), dtype=jnp.float32)))

    # --- clone + crowd filter: the reference builds a crowd-filtered target_
    #     but then passes the ORIGINAL target to random_horizontal_flip, so the
    #     filtered copy is discarded; we reproduce that behavior faithfully. ---
    img_ = img

    # --- color jitter (Pallas kernels; factors/flags are runtime SMEM scalars,
    #     so one compiled kernel covers every random draw) ---
    if cfg["color_jitter_enabled"]:
        apply_b = bool(u[0] < 0.5)
        b_factor = _lerp(u[1], 1.0 - cfg["max_brightness_factor"],
                         1.0 + cfg["max_brightness_factor"])
        contrast_first = bool(u[2] < 0.5)
        apply_c = bool(u[3] < 0.5)
        c_factor = _lerp(u[4], 1.0 - cfg["max_contrast_factor"],
                         1.0 + cfg["max_contrast_factor"])
        apply_s = bool(u[5] < 0.5)
        s_factor = _lerp(u[6], 1.0 - cfg["max_saturation_factor"],
                         1.0 + cfg["max_saturation_factor"])
        apply_h = bool(u[7] < 0.5)
        h_delta = _lerp(u[8], -cfg["max_hue_delta"], cfg["max_hue_delta"])

        flags_np = np.zeros(8, np.int32)
        flags_np[0] = apply_b
        flags_np[1] = apply_c and contrast_first
        flags_np[2] = apply_s
        flags_np[3] = apply_h
        flags_np[4] = apply_c and (not contrast_first)
        factors_np = np.zeros(8, np.float32)
        factors_np[0] = b_factor
        factors_np[1] = c_factor
        factors_np[2] = s_factor
        factors_np[3] = h_delta

        flags = jnp.asarray(flags_np)
        factors = jnp.asarray(factors_np)
        if apply_c:
            # gray-mean pass + jitter fused into one jit (one dispatch, no extra
            # full-image staging copies)
            img_ = _color_jitter_with_mean_call(flags, factors, img_)
        else:
            img_ = _color_jitter_call(flags, factors, img_)

    # --- random horizontal flip (applied to the ORIGINAL target, as in torch) ---
    masks = target["masks"]
    labels = target["labels"]
    if bool(u[9] < 0.5):
        img_ = jnp.flip(img_, axis=-1)
        masks = jnp.flip(masks, axis=-1)
    target_ = {"masks": masks, "labels": labels}

    # --- scale jitter ---
    scale = _lerp(u[10], cfg["scale_range"][0], cfg["scale_range"][1])
    h, w = img_.shape[-2], img_.shape[-1]
    r = min(img_size[-2] / h, img_size[-1] / w) * scale
    new_h, new_w = int(h * r), int(w * r)
    # TODO(synk): torchvision resizes the image bilinearly with antialias=True;
    # jax.image.resize 'linear' has no antialiasing (masks use nearest, identical).
    img_ = jax.image.resize(img_, (img_.shape[0], new_h, new_w), method="linear")
    m = target_["masks"].astype(jnp.float32)
    m = jax.image.resize(m, (m.shape[0], new_h, new_w), method="nearest")
    target_["masks"] = m > 0.5

    # --- pad (right / bottom only, like F.pad([0, 0, pad_w, pad_h])) ---
    pad_h = max(0, img_size[-2] - new_h)
    pad_w = max(0, img_size[-1] - new_w)
    img_ = jnp.pad(img_, ((0, 0), (0, pad_h), (0, pad_w)))
    target_["masks"] = jnp.pad(target_["masks"], ((0, 0), (0, pad_h), (0, pad_w)))

    # --- random crop to img_size ---
    H2, W2 = img_.shape[-2], img_.shape[-1]
    th, tw = img_size
    top = min(int(float(u[11]) * (H2 - th + 1)), H2 - th)
    left = min(int(float(u[12]) * (W2 - tw + 1)), W2 - tw)
    img_ = img_[:, top:top + th, left:left + tw]
    target_["masks"] = target_["masks"][:, top:top + th, left:left + tw]

    # --- per-mask spatial sum (Pallas reduction kernel) + non-empty filter ---
    sums = _mask_sums_call(target_["masks"])
    non_empty = np.asarray(jax.device_get(sums)) > 0     # single sync
    if non_empty.sum() == 0:
        return None  # reference recurses; caller retries with a new key
    keep = np.nonzero(non_empty)[0]
    target_["masks"] = jnp.take(target_["masks"], keep, axis=0)
    target_["labels"] = jnp.take(target_["labels"], keep, axis=0)
    return img_, target_


# ----------------------------------------------------------------------------
# main
# ----------------------------------------------------------------------------

if __name__ == "__main__":
    cfg = dict(
        img_size=(16, 16),
        color_jitter_enabled=True,
        scale_range=(0.8, 1.25),
        max_brightness_factor=32 / 255.0,
        max_contrast_factor=0.5,
        max_saturation_factor=0.5,
        max_hue_delta=18 / 360.0,
    )

    key = jax.random.PRNGKey(0)
    data_key, aug_key = jax.random.split(key)

    H = W = 16
    M = 5
    img = jax.random.uniform(data_key, (3, H, W), dtype=jnp.float32)

    # deterministic rectangular blob masks
    ys = jnp.arange(H)[None, :, None]
    xs = jnp.arange(W)[None, None, :]
    tops = jnp.array([0, 2, 4, 6, 8])[:, None, None]
    lefts = jnp.array([1, 3, 5, 7, 9])[:, None, None]
    masks = (ys >= tops) & (ys < tops + 6) & (xs >= lefts) & (xs < lefts + 6)
    labels = jnp.arange(1, M + 1, dtype=jnp.int32)
    is_crowd = jnp.array([False, False, True, False, False])

    target = {"masks": masks, "labels": labels, "is_crowd": is_crowd}

    result = None
    attempt = 0
    while result is None and attempt < 8:
        result = transforms_forward(img, target,
                                    jax.random.fold_in(aug_key, attempt), cfg)
        attempt += 1
    assert result is not None, "all masks empty after 8 attempts"

    img_out, target_out = result
    jax.block_until_ready(img_out)
    jax.block_until_ready(target_out["masks"])
    jax.block_until_ready(target_out["labels"])

    assert img_out.shape == (3,) + cfg["img_size"]
    assert target_out["masks"].shape[1:] == cfg["img_size"]
    assert target_out["labels"].shape[0] == target_out["masks"].shape[0]
    assert bool(jnp.all(jnp.isfinite(img_out)))

    print("KERNEL_OK")
</pallas_src>

<mosaic_0001>
module attributes {stable_mosaic.version = 11 : i64} {
  func.func @_gray_partials_kernel(%arg0: i32, %arg1: memref<8xi32, #tpu.memory_space<smem>>, %arg2: memref<8xf32, #tpu.memory_space<smem>>, %arg3: memref<3x16x16xf32, #tpu.memory_space<vmem>>, %arg4: memref<8x16xf32, #tpu.memory_space<vmem>>) attributes {dimension_semantics = [#tpu.dimension_semantics<parallel>], iteration_bounds = array<i64: 1>, scalar_prefetch = 2 : i64, scratch_operands = 0 : i64, tpu.core_type = #tpu.core_type<tc>, window_params = [{transform_indices = @transform_0, window_bounds = array<i64: 3, 16, 16>}, {transform_indices = @transform_1, window_bounds = array<i64: 8, 16>}]} {
    %c0 = arith.constant 0 : index
    %0 = memref.load %arg1[%c0] : memref<8xi32, #tpu.memory_space<smem>>
    %c0_i32 = arith.constant 0 : i32
    %1 = arith.cmpi sgt, %0, %c0_i32 : i32
    %c4 = arith.constant 4 : index
    %2 = memref.load %arg1[%c4] : memref<8xi32, #tpu.memory_space<smem>>
    %c0_i32_0 = arith.constant 0 : i32
    %3 = arith.cmpi sgt, %2, %c0_i32_0 : i32
    %c2 = arith.constant 2 : index
    %4 = memref.load %arg1[%c2] : memref<8xi32, #tpu.memory_space<smem>>
    %c0_i32_1 = arith.constant 0 : i32
    %5 = arith.cmpi sgt, %4, %c0_i32_1 : i32
    %6 = arith.andi %5, %3 : i1
    %c3 = arith.constant 3 : index
    %7 = memref.load %arg1[%c3] : memref<8xi32, #tpu.memory_space<smem>>
    %c0_i32_2 = arith.constant 0 : i32
    %8 = arith.cmpi sgt, %7, %c0_i32_2 : i32
    %9 = arith.andi %8, %3 : i1
    %c0_3 = arith.constant 0 : index
    %10 = memref.load %arg2[%c0_3] : memref<8xf32, #tpu.memory_space<smem>>
    %c2_4 = arith.constant 2 : index
    %11 = memref.load %arg2[%c2_4] : memref<8xf32, #tpu.memory_space<smem>>
    %c3_5 = arith.constant 3 : index
    %12 = memref.load %arg2[%c3_5] : memref<8xf32, #tpu.memory_space<smem>>
    %13 = tpu.iota {dimensions = array<i32: 0>} : vector<16x16xi32>
    %c16_i32 = arith.constant 16 : i32
    %14 = arith.muli %arg0, %c16_i32 : i32
    %15 = vector.broadcast %14 : i32 to vector<16x16xi32>
    %16 = arith.addi %13, %15 : vector<16x16xi32>
    %c16_i32_6 = arith.constant 16 : i32
    %17 = vector.broadcast %c16_i32_6 : i32 to vector<16x16xi32>
    %18 = arith.cmpi slt, %16, %17 : vector<16x16xi32>
    %c0_7 = arith.constant 0 : index
    %c0_8 = arith.constant 0 : index
    %c0_9 = arith.constant 0 : index
    %19 = vector.load %arg3[%c0_7, %c0_8, %c0_9] : memref<3x16x16xf32, #tpu.memory_space<vmem>>, vector<1x16x16xf32>
    %20 = vector.shape_cast %19 : vector<1x16x16xf32> to vector<16x16xf32>
    %c1 = arith.constant 1 : index
    %c0_10 = arith.constant 0 : index
    %c0_11 = arith.constant 0 : index
    %21 = vector.load %arg3[%c1, %c0_10, %c0_11] : memref<3x16x16xf32, #tpu.memory_space<vmem>>, vector<1x16x16xf32>
    %22 = vector.shape_cast %21 : vector<1x16x16xf32> to vector<16x16xf32>
    %c2_12 = arith.constant 2 : index
    %c0_13 = arith.constant 0 : index
    %c0_14 = arith.constant 0 : index
    %23 = vector.load %arg3[%c2_12, %c0_13, %c0_14] : memref<3x16x16xf32, #tpu.memory_space<vmem>>, vector<1x16x16xf32>
    %24 = vector.shape_cast %23 : vector<1x16x16xf32> to vector<16x16xf32>
    %25 = vector.broadcast %10 : f32 to vector<16x16xf32>
    %26 = arith.mulf %20, %25 : vector<16x16xf32>
    %cst = arith.constant 0.000000e+00 : f32
    %cst_15 = arith.constant 1.000000e+00 : f32
    %27 = vector.broadcast %cst : f32 to vector<16x16xf32>
    %28 = arith.maximumf %27, %26 : vector<16x16xf32>
    %29 = vector.broadcast %cst_15 : f32 to vector<16x16xf32>
    %30 = arith.minimumf %29, %28 : vector<16x16xf32>
    %31 = vector.broadcast %10 : f32 to vector<16x16xf32>
    %32 = arith.mulf %22, %31 : vector<16x16xf32>
    %cst_16 = arith.constant 0.000000e+00 : f32
    %cst_17 = arith.constant 1.000000e+00 : f32
    %33 = vector.broadcast %cst_16 : f32 to vector<16x16xf32>
    %34 = arith.maximumf %33, %32 : vector<16x16xf32>
    %35 = vector.broadcast %cst_17 : f32 to vector<16x16xf32>
    %36 = arith.minimumf %35, %34 : vector<16x16xf32>
    %37 = vector.broadcast %10 : f32 to vector<16x16xf32>
    %38 = arith.mulf %24, %37 : vector<16x16xf32>
    %cst_18 = arith.constant 0.000000e+00 : f32
    %cst_19 = arith.constant 1.000000e+00 : f32
    %39 = vector.broadcast %cst_18 : f32 to vector<16x16xf32>
    %40 = arith.maximumf %39, %38 : vector<16x16xf32>
    %41 = vector.broadcast %cst_19 : f32 to vector<16x16xf32>
    %42 = arith.minimumf %41, %40 : vector<16x16xf32>
    %43 = arith.select %1, %30, %20 : vector<16x16xf32>
    %44 = arith.select %1, %36, %22 : vector<16x16xf32>
    %45 = arith.select %1, %42, %24 : vector<16x16xf32>
    %cst_20 = arith.constant 2.989000e-01 : f32
    %46 = vector.broadcast %cst_20 : f32 to vector<16x16xf32>
    %47 = arith.mulf %46, %43 : vector<16x16xf32>
    %cst_21 = arith.constant 5.870000e-01 : f32
    %48 = vector.broadcast %cst_21 : f32 to vector<16x16xf32>
    %49 = arith.mulf %48, %44 : vector<16x16xf32>
    %50 = arith.addf %47, %49 : vector<16x16xf32>
    %cst_22 = arith.constant 1.140000e-01 : f32
    %51 = vector.broadcast %cst_22 : f32 to vector<16x16xf32>
    %52 = arith.mulf %51, %45 : vector<16x16xf32>
    %53 = arith.addf %50, %52 : vector<16x16xf32>
    %54 = vector.broadcast %11 : f32 to vector<16x16xf32>
    %55 = arith.mulf %54, %43 : vector<16x16xf32>
    %cst_23 = arith.constant 1.000000e+00 : f32
    %56 = arith.subf %cst_23, %11 : f32
    %57 = vector.broadcast %56 : f32 to vector<16x16xf32>
    %58 = arith.mulf %57, %53 : vector<16x16xf32>
    %59 = arith.addf %55, %58 : vector<16x16xf32>
    %cst_24 = arith.constant 0.000000e+00 : f32
    %cst_25 = arith.constant 1.000000e+00 : f32
    %60 = vector.broadcast %cst_24 : f32 to vector<16x16xf32>
    %61 = arith.maximumf %60, %59 : vector<16x16xf32>
    %62 = vector.broadcast %cst_25 : f32 to vector<16x16xf32>
    %63 = arith.minimumf %62, %61 : vector<16x16xf32>
    %64 = vector.broadcast %11 : f32 to vector<16x16xf32>
    %65 = arith.mulf %64, %44 : vector<16x16xf32>
    %cst_26 = arith.constant 1.000000e+00 : f32
    %66 = arith.subf %cst_26, %11 : f32
    %67 = vector.broadcast %66 : f32 to vector<16x16xf32>
    %68 = arith.mulf %67, %53 : vector<16x16xf32>
    %69 = arith.addf %65, %68 : vector<16x16xf32>
    %cst_27 = arith.constant 0.000000e+00 : f32
    %cst_28 = arith.constant 1.000000e+00 : f32
    %70 = vector.broadcast %cst_27 : f32 to vector<16x16xf32>
    %71 = arith.maximumf %70, %69 : vector<16x16xf32>
    %72 = vector.broadcast %cst_28 : f32 to vector<16x16xf32>
    %73 = arith.minimumf %72, %71 : vector<16x16xf32>
    %74 = vector.broadcast %11 : f32 to vector<16x16xf32>
    %75 = arith.mulf %74, %45 : vector<16x16xf32>
    %cst_29 = arith.constant 1.000000e+00 : f32
    %76 = arith.subf %cst_29, %11 : f32
    %77 = vector.broadcast %76 : f32 to vector<16x16xf32>
    %78 = arith.mulf %77, %53 : vector<16x16xf32>
    %79 = arith.addf %75, %78 : vector<16x16xf32>
    %cst_30 = arith.constant 0.000000e+00 : f32
    %cst_31 = arith.constant 1.000000e+00 : f32
    %80 = vector.broadcast %cst_30 : f32 to vector<16x16xf32>
    %81 = arith.maximumf %80, %79 : vector<16x16xf32>
    %82 = vector.broadcast %cst_31 : f32 to vector<16x16xf32>
    %83 = arith.minimumf %82, %81 : vector<16x16xf32>
    %84 = arith.select %6, %63, %43 : vector<16x16xf32>
    %85 = arith.select %6, %73, %44 : vector<16x16xf32>
    %86 = arith.select %6, %83, %45 : vector<16x16xf32>
    %87 = arith.extui %9 : i1 to i32
    %c0_i32_32 = arith.constant 0 : i32
    %88 = arith.cmpi ne, %87, %c0_i32_32 : i32
    scf.if %88 {
      %92 = arith.maximumf %84, %85 : vector<16x16xf32>
      %93 = arith.maximumf %92, %86 : vector<16x16xf32>
      %94 = arith.minimumf %84, %85 : vector<16x16xf32>
      %95 = arith.minimumf %94, %86 : vector<16x16xf32>
      %96 = arith.cmpf oeq, %93, %95 : vector<16x16xf32>
      %97 = arith.subf %93, %95 : vector<16x16xf32>
      %cst_34 = arith.constant 1.000000e+00 : f32
      %98 = vector.broadcast %cst_34 : f32 to vector<16x16xf32>
      %99 = arith.select %96, %98, %93 : vector<16x16xi1>, vector<16x16xf32>
      %100 = arith.divf %97, %99 : vector<16x16xf32>
      %101 = arith.select %96, %98, %97 : vector<16x16xi1>, vector<16x16xf32>
      %cst_35 = arith.constant 1.000000e+00 : f32
      %102 = vector.broadcast %cst_35 : f32 to vector<16x16xf32>
      %103 = arith.divf %102, %101 : vector<16x16xf32>
      %104 = arith.subf %93, %84 : vector<16x16xf32>
      %105 = arith.mulf %104, %103 : vector<16x16xf32>
      %106 = arith.subf %93, %85 : vector<16x16xf32>
      %107 = arith.mulf %106, %103 : vector<16x16xf32>
      %108 = arith.subf %93, %86 : vector<16x16xf32>
      %109 = arith.mulf %108, %103 : vector<16x16xf32>
      %110 = arith.cmpf oeq, %93, %84 : vector<16x16xf32>
      %111 = arith.subf %109, %107 : vector<16x16xf32>
      %cst_36 = arith.constant 0.000000e+00 : f32
      %112 = vector.broadcast %cst_36 : f32 to vector<16x16xf32>
      %113 = arith.select %110, %111, %112 : vector<16x16xi1>, vector<16x16xf32>
      %114 = arith.cmpf oeq, %93, %85 : vector<16x16xf32>
      %115 = arith.cmpf one, %93, %84 : vector<16x16xf32>
      %116 = arith.andi %114, %115 : vector<16x16xi1>
      %cst_37 = arith.constant 2.000000e+00 : f32
      %117 = vector.broadcast %cst_37 : f32 to vector<16x16xf32>
      %118 = arith.addf %117, %105 : vector<16x16xf32>
      %119 = arith.subf %118, %109 : vector<16x16xf32>
      %cst_38 = arith.constant 0.000000e+00 : f32
      %120 = vector.broadcast %cst_38 : f32 to vector<16x16xf32>
      %121 = arith.select %116, %119, %120 : vector<16x16xi1>, vector<16x16xf32>
      %122 = arith.cmpf one, %93, %85 : vector<16x16xf32>
      %123 = arith.cmpf one, %93, %84 : vector<16x16xf32>
      %124 = arith.andi %122, %123 : vector<16x16xi1>
      %cst_39 = arith.constant 4.000000e+00 : f32
      %125 = vector.broadcast %cst_39 : f32 to vector<16x16xf32>
      %126 = arith.addf %125, %107 : vector<16x16xf32>
      %127 = arith.subf %126, %105 : vector<16x16xf32>
      %cst_40 = arith.constant 0.000000e+00 : f32
      %128 = vector.broadcast %cst_40 : f32 to vector<16x16xf32>
      %129 = arith.select %124, %127, %128 : vector<16x16xi1>, vector<16x16xf32>
      %130 = arith.addf %113, %121 : vector<16x16xf32>
      %131 = arith.addf %130, %129 : vector<16x16xf32>
      %cst_41 = arith.constant 0.166666672 : f32
      %132 = vector.broadcast %cst_41 : f32 to vector<16x16xf32>
      %133 = arith.mulf %131, %132 : vector<16x16xf32>
      %cst_42 = arith.constant 1.000000e+00 : f32
      %134 = vector.broadcast %cst_42 : f32 to vector<16x16xf32>
      %135 = arith.addf %133, %134 : vector<16x16xf32>
      %136 = math.floor %135 : vector<16x16xf32>
      %137 = arith.subf %135, %136 : vector<16x16xf32>
      %138 = vector.broadcast %12 : f32 to vector<16x16xf32>
      %139 = arith.addf %137, %138 : vector<16x16xf32>
      %140 = math.floor %139 : vector<16x16xf32>
      %141 = arith.subf %139, %140 : vector<16x16xf32>
      %cst_43 = arith.constant 6.000000e+00 : f32
      %142 = vector.broadcast %cst_43 : f32 to vector<16x16xf32>
      %143 = arith.mulf %141, %142 : vector<16x16xf32>
      %cst_44 = arith.constant 5.000000e+00 : f32
      %144 = vector.broadcast %cst_44 : f32 to vector<16x16xf32>
      %145 = arith.addf %144, %143 : vector<16x16xf32>
      %cst_45 = arith.constant 6.000000e+00 : f32
      %146 = vector.broadcast %cst_45 : f32 to vector<16x16xf32>
      %147 = arith.cmpf oge, %145, %146 : vector<16x16xf32>
      %cst_46 = arith.constant 6.000000e+00 : f32
      %cst_47 = arith.constant 0.000000e+00 : f32
      %148 = vector.broadcast %cst_46 : f32 to vector<16x16xf32>
      %149 = vector.broadcast %cst_47 : f32 to vector<16x16xf32>
      %150 = arith.select %147, %148, %149 : vector<16x16xi1>, vector<16x16xf32>
      %151 = arith.subf %145, %150 : vector<16x16xf32>
      %cst_48 = arith.constant 4.000000e+00 : f32
      %152 = vector.broadcast %cst_48 : f32 to vector<16x16xf32>
      %153 = arith.subf %152, %151 : vector<16x16xf32>
      %154 = arith.minimumf %151, %153 : vector<16x16xf32>
      %cst_49 = arith.constant 0.000000e+00 : f32
      %cst_50 = arith.constant 1.000000e+00 : f32
      %155 = vector.broadcast %cst_49 : f32 to vector<16x16xf32>
      %156 = arith.maximumf %155, %154 : vector<16x16xf32>
      %157 = vector.broadcast %cst_50 : f32 to vector<16x16xf32>
      %158 = arith.minimumf %157, %156 : vector<16x16xf32>
      %159 = arith.mulf %93, %100 : vector<16x16xf32>
      %160 = arith.mulf %159, %158 : vector<16x16xf32>
      %161 = arith.subf %93, %160 : vector<16x16xf32>
      %cst_51 = arith.constant 0.000000e+00 : f32
      %cst_52 = arith.constant 1.000000e+00 : f32
      %162 = vector.broadcast %cst_51 : f32 to vector<16x16xf32>
      %163 = arith.maximumf %162, %161 : vector<16x16xf32>
      %164 = vector.broadcast %cst_52 : f32 to vector<16x16xf32>
      %165 = arith.minimumf %164, %163 : vector<16x16xf32>
      %cst_53 = arith.constant 3.000000e+00 : f32
      %166 = vector.broadcast %cst_53 : f32 to vector<16x16xf32>
      %167 = arith.addf %166, %143 : vector<16x16xf32>
      %cst_54 = arith.constant 6.000000e+00 : f32
      %168 = vector.broadcast %cst_54 : f32 to vector<16x16xf32>
      %169 = arith.cmpf oge, %167, %168 : vector<16x16xf32>
      %cst_55 = arith.constant 6.000000e+00 : f32
      %cst_56 = arith.constant 0.000000e+00 : f32
      %170 = vector.broadcast %cst_55 : f32 to vector<16x16xf32>
      %171 = vector.broadcast %cst_56 : f32 to vector<16x16xf32>
      %172 = arith.select %169, %170, %171 : vector<16x16xi1>, vector<16x16xf32>
      %173 = arith.subf %167, %172 : vector<16x16xf32>
      %cst_57 = arith.constant 4.000000e+00 : f32
      %174 = vector.broadcast %cst_57 : f32 to vector<16x16xf32>
      %175 = arith.subf %174, %173 : vector<16x16xf32>
      %176 = arith.minimumf %173, %175 : vector<16x16xf32>
      %cst_58 = arith.constant 0.000000e+00 : f32
      %cst_59 = arith.constant 1.000000e+00 : f32
      %177 = vector.broadcast %cst_58 : f32 to vector<16x16xf32>
      %178 = arith.maximumf %177, %176 : vector<16x16xf32>
      %179 = vector.broadcast %cst_59 : f32 to vector<16x16xf32>
      %180 = arith.minimumf %179, %178 : vector<16x16xf32>
      %181 = arith.mulf %93, %100 : vector<16x16xf32>
      %182 = arith.mulf %181, %180 : vector<16x16xf32>
      %183 = arith.subf %93, %182 : vector<16x16xf32>
      %cst_60 = arith.constant 0.000000e+00 : f32
      %cst_61 = arith.constant 1.000000e+00 : f32
      %184 = vector.broadcast %cst_60 : f32 to vector<16x16xf32>
      %185 = arith.maximumf %184, %183 : vector<16x16xf32>
      %186 = vector.broadcast %cst_61 : f32 to vector<16x16xf32>
      %187 = arith.minimumf %186, %185 : vector<16x16xf32>
      %cst_62 = arith.constant 1.000000e+00 : f32
      %188 = vector.broadcast %cst_62 : f32 to vector<16x16xf32>
      %189 = arith.addf %188, %143 : vector<16x16xf32>
      %cst_63 = arith.constant 6.000000e+00 : f32
      %190 = vector.broadcast %cst_63 : f32 to vector<16x16xf32>
      %191 = arith.cmpf oge, %189, %190 : vector<16x16xf32>
      %cst_64 = arith.constant 6.000000e+00 : f32
      %cst_65 = arith.constant 0.000000e+00 : f32
      %192 = vector.broadcast %cst_64 : f32 to vector<16x16xf32>
      %193 = vector.broadcast %cst_65 : f32 to vector<16x16xf32>
      %194 = arith.select %191, %192, %193 : vector<16x16xi1>, vector<16x16xf32>
      %195 = arith.subf %189, %194 : vector<16x16xf32>
      %cst_66 = arith.constant 4.000000e+00 : f32
      %196 = vector.broadcast %cst_66 : f32 to vector<16x16xf32>
      %197 = arith.subf %196, %195 : vector<16x16xf32>
      %198 = arith.minimumf %195, %197 : vector<16x16xf32>
      %cst_67 = arith.constant 0.000000e+00 : f32
      %cst_68 = arith.constant 1.000000e+00 : f32
      %199 = vector.broadcast %cst_67 : f32 to vector<16x16xf32>
      %200 = arith.maximumf %199, %198 : vector<16x16xf32>
      %201 = vector.broadcast %cst_68 : f32 to vector<16x16xf32>
      %202 = arith.minimumf %201, %200 : vector<16x16xf32>
      %203 = arith.mulf %93, %100 : vector<16x16xf32>
      %204 = arith.mulf %203, %202 : vector<16x16xf32>
      %205 = arith.subf %93, %204 : vector<16x16xf32>
      %cst_69 = arith.constant 0.000000e+00 : f32
      %cst_70 = arith.constant 1.000000e+00 : f32
      %206 = vector.broadcast %cst_69 : f32 to vector<16x16xf32>
      %207 = arith.maximumf %206, %205 : vector<16x16xf32>
      %208 = vector.broadcast %cst_70 : f32 to vector<16x16xf32>
      %209 = arith.minimumf %208, %207 : vector<16x16xf32>
      %cst_71 = arith.constant 2.989000e-01 : f32
      %210 = vector.broadcast %cst_71 : f32 to vector<16x16xf32>
      %211 = arith.mulf %210, %165 : vector<16x16xf32>
      %cst_72 = arith.constant 5.870000e-01 : f32
      %212 = vector.broadcast %cst_72 : f32 to vector<16x16xf32>
      %213 = arith.mulf %212, %187 : vector<16x16xf32>
      %214 = arith.addf %211, %213 : vector<16x16xf32>
      %cst_73 = arith.constant 1.140000e-01 : f32
      %215 = vector.broadcast %cst_73 : f32 to vector<16x16xf32>
      %216 = arith.mulf %215, %209 : vector<16x16xf32>
      %217 = arith.addf %214, %216 : vector<16x16xf32>
      %cst_74 = arith.constant 0.000000e+00 : f32
      %218 = vector.broadcast %cst_74 : f32 to vector<16x16xf32>
      %219 = arith.select %18, %217, %218 : vector<16x16xi1>, vector<16x16xf32>
      %cst_75 = arith.constant 0.000000e+00 : f32
      %220 = vector.broadcast %cst_75 : f32 to vector<8x16xf32>
      %c0_76 = arith.constant 0 : index
      %c0_77 = arith.constant 0 : index
      %221 = vector.load %arg4[%c0_76, %c0_77] : memref<8x16xf32, #tpu.memory_space<vmem>>, vector<8x16xf32>
      tpu.vector_store %arg4[%c0_76, %c0_77], %220 {strides = array<i32>} : memref<8x16xf32, #tpu.memory_space<vmem>>, vector<8x16xf32>,
      %cst_78 = arith.constant dense<0.000000e+00> : vector<16xf32>
      %222 = vector.multi_reduction <add>, %219, %cst_78 [0] : vector<16x16xf32> to vector<16xf32>
      %223 = vector.shape_cast %222 : vector<16xf32> to vector<1x16xf32>
      %c0_79 = arith.constant 0 : index
      %c0_80 = arith.constant 0 : index
      %224 = vector.load %arg4[%c0_79, %c0_80] : memref<8x16xf32, #tpu.memory_space<vmem>>, vector<1x16xf32>
      tpu.vector_store %arg4[%c0_79, %c0_80], %223 {strides = array<i32>} : memref<8x16xf32, #tpu.memory_space<vmem>>, vector<1x16xf32>,
    } else {
    }
    %true = arith.constant true
    %89 = arith.xori %9, %true : i1
    %90 = arith.extui %89 : i1 to i32
    %c0_i32_33 = arith.constant 0 : i32
    %91 = arith.cmpi ne, %90, %c0_i32_33 : i32
    scf.if %91 {
      %cst_34 = arith.constant 2.989000e-01 : f32
      %92 = vector.broadcast %cst_34 : f32 to vector<16x16xf32>
      %93 = arith.mulf %92, %84 : vector<16x16xf32>
      %cst_35 = arith.constant 5.870000e-01 : f32
      %94 = vector.broadcast %cst_35 : f32 to vector<16x16xf32>
      %95 = arith.mulf %94, %85 : vector<16x16xf32>
      %96 = arith.addf %93, %95 : vector<16x16xf32>
      %cst_36 = arith.constant 1.140000e-01 : f32
      %97 = vector.broadcast %cst_36 : f32 to vector<16x16xf32>
      %98 = arith.mulf %97, %86 : vector<16x16xf32>
      %99 = arith.addf %96, %98 : vector<16x16xf32>
      %cst_37 = arith.constant 0.000000e+00 : f32
      %100 = vector.broadcast %cst_37 : f32 to vector<16x16xf32>
      %101 = arith.select %18, %99, %100 : vector<16x16xi1>, vector<16x16xf32>
      %cst_38 = arith.constant 0.000000e+00 : f32
      %102 = vector.broadcast %cst_38 : f32 to vector<8x16xf32>
      %c0_39 = arith.constant 0 : index
      %c0_40 = arith.constant 0 : index
      %103 = vector.load %arg4[%c0_39, %c0_40] : memref<8x16xf32, #tpu.memory_space<vmem>>, vector<8x16xf32>
      tpu.vector_store %arg4[%c0_39, %c0_40], %102 {strides = array<i32>} : memref<8x16xf32, #tpu.memory_space<vmem>>, vector<8x16xf32>,
      %cst_41 = arith.constant dense<0.000000e+00> : vector<16xf32>
      %104 = vector.multi_reduction <add>, %101, %cst_41 [0] : vector<16x16xf32> to vector<16xf32>
      %105 = vector.shape_cast %104 : vector<16xf32> to vector<1x16xf32>
      %c0_42 = arith.constant 0 : index
      %c0_43 = arith.constant 0 : index
      %106 = vector.load %arg4[%c0_42, %c0_43] : memref<8x16xf32, #tpu.memory_space<vmem>>, vector<1x16xf32>
      tpu.vector_store %arg4[%c0_42, %c0_43], %105 {strides = array<i32>} : memref<8x16xf32, #tpu.memory_space<vmem>>, vector<1x16xf32>,
    } else {
    }
    return
  }
  func.func @transform_0(%arg0: i32, %arg1: memref<8xi32, #tpu.memory_space<smem>>, %arg2: memref<8xf32, #tpu.memory_space<smem>>) -> (i32, i32, i32) {
    %c0_i32 = arith.constant 0 : i32
    %c0_i32_0 = arith.constant 0 : i32
    %c0_i32_1 = arith.constant 0 : i32
    return %c0_i32, %arg0, %c0_i32_0 : i32, i32, i32
  }
  func.func @transform_1(%arg0: i32, %arg1: memref<8xi32, #tpu.memory_space<smem>>, %arg2: memref<8xf32, #tpu.memory_space<smem>>) -> (i32, i32) {
    %c0_i32 = arith.constant 0 : i32
    %c0_i32_0 = arith.constant 0 : i32
    return %arg0, %c0_i32 : i32, i32
  }
}

module attributes {stable_mosaic.version = 11 : i64} {
  func.func @_color_jitter_kernel(%arg0: i32, %arg1: memref<8xi32, #tpu.memory_space<smem>>, %arg2: memref<8xf32, #tpu.memory_space<smem>>, %arg3: memref<3x16x16xf32, #tpu.memory_space<vmem>>, %arg4: memref<3x16x16xf32, #tpu.memory_space<vmem>>) attributes {dimension_semantics = [#tpu.dimension_semantics<parallel>], iteration_bounds = array<i64: 1>, scalar_prefetch = 2 : i64, scratch_operands = 0 : i64, tpu.core_type = #tpu.core_type<tc>, window_params = [{transform_indices = @transform_0, window_bounds = array<i64: 3, 16, 16>}, {transform_indices = @transform_1, window_bounds = array<i64: 3, 16, 16>}]} {
    %c0 = arith.constant 0 : index
    %0 = memref.load %arg1[%c0] : memref<8xi32, #tpu.memory_space<smem>>
    %c0_i32 = arith.constant 0 : i32
    %1 = arith.cmpi sgt, %0, %c0_i32 : i32
    %c1 = arith.constant 1 : index
    %2 = memref.load %arg1[%c1] : memref<8xi32, #tpu.memory_space<smem>>
    %c0_i32_0 = arith.constant 0 : i32
    %3 = arith.cmpi sgt, %2, %c0_i32_0 : i32
    %c2 = arith.constant 2 : index
    %4 = memref.load %arg1[%c2] : memref<8xi32, #tpu.memory_space<smem>>
    %c0_i32_1 = arith.constant 0 : i32
    %5 = arith.cmpi sgt, %4, %c0_i32_1 : i32
    %c3 = arith.constant 3 : index
    %6 = memref.load %arg1[%c3] : memref<8xi32, #tpu.memory_space<smem>>
    %c0_i32_2 = arith.constant 0 : i32
    %7 = arith.cmpi sgt, %6, %c0_i32_2 : i32
    %c4 = arith.constant 4 : index
    %8 = memref.load %arg1[%c4] : memref<8xi32, #tpu.memory_space<smem>>
    %c0_i32_3 = arith.constant 0 : i32
    %9 = arith.cmpi sgt, %8, %c0_i32_3 : i32
    %c0_4 = arith.constant 0 : index
    %10 = memref.load %arg2[%c0_4] : memref<8xf32, #tpu.memory_space<smem>>
    %c1_5 = arith.constant 1 : index
    %11 = memref.load %arg2[%c1_5] : memref<8xf32, #tpu.memory_space<smem>>
    %c2_6 = arith.constant 2 : index
    %12 = memref.load %arg2[%c2_6] : memref<8xf32, #tpu.memory_space<smem>>
    %c3_7 = arith.constant 3 : index
    %13 = memref.load %arg2[%c3_7] : memref<8xf32, #tpu.memory_space<smem>>
    %c4_8 = arith.constant 4 : index
    %14 = memref.load %arg2[%c4_8] : memref<8xf32, #tpu.memory_space<smem>>
    %c0_9 = arith.constant 0 : index
    %c0_10 = arith.constant 0 : index
    %c0_11 = arith.constant 0 : index
    %15 = vector.load %arg3[%c0_9, %c0_10, %c0_11] : memref<3x16x16xf32, #tpu.memory_space<vmem>>, vector<1x16x16xf32>
    %16 = vector.shape_cast %15 : vector<1x16x16xf32> to vector<16x16xf32>
    %c1_12 = arith.constant 1 : index
    %c0_13 = arith.constant 0 : index
    %c0_14 = arith.constant 0 : index
    %17 = vector.load %arg3[%c1_12, %c0_13, %c0_14] : memref<3x16x16xf32, #tpu.memory_space<vmem>>, vector<1x16x16xf32>
    %18 = vector.shape_cast %17 : vector<1x16x16xf32> to vector<16x16xf32>
    %c2_15 = arith.constant 2 : index
    %c0_16 = arith.constant 0 : index
    %c0_17 = arith.constant 0 : index
    %19 = vector.load %arg3[%c2_15, %c0_16, %c0_17] : memref<3x16x16xf32, #tpu.memory_space<vmem>>, vector<1x16x16xf32>
    %20 = vector.shape_cast %19 : vector<1x16x16xf32> to vector<16x16xf32>
    %21 = vector.broadcast %10 : f32 to vector<16x16xf32>
    %22 = arith.mulf %16, %21 : vector<16x16xf32>
    %cst = arith.constant 0.000000e+00 : f32
    %cst_18 = arith.constant 1.000000e+00 : f32
    %23 = vector.broadcast %cst : f32 to vector<16x16xf32>
    %24 = arith.maximumf %23, %22 : vector<16x16xf32>
    %25 = vector.broadcast %cst_18 : f32 to vector<16x16xf32>
    %26 = arith.minimumf %25, %24 : vector<16x16xf32>
    %27 = vector.broadcast %10 : f32 to vector<16x16xf32>
    %28 = arith.mulf %18, %27 : vector<16x16xf32>
    %cst_19 = arith.constant 0.000000e+00 : f32
    %cst_20 = arith.constant 1.000000e+00 : f32
    %29 = vector.broadcast %cst_19 : f32 to vector<16x16xf32>
    %30 = arith.maximumf %29, %28 : vector<16x16xf32>
    %31 = vector.broadcast %cst_20 : f32 to vector<16x16xf32>
    %32 = arith.minimumf %31, %30 : vector<16x16xf32>
    %33 = vector.broadcast %10 : f32 to vector<16x16xf32>
    %34 = arith.mulf %20, %33 : vector<16x16xf32>
    %cst_21 = arith.constant 0.000000e+00 : f32
    %cst_22 = arith.constant 1.000000e+00 : f32
    %35 = vector.broadcast %cst_21 : f32 to vector<16x16xf32>
    %36 = arith.maximumf %35, %34 : vector<16x16xf32>
    %37 = vector.broadcast %cst_22 : f32 to vector<16x16xf32>
    %38 = arith.minimumf %37, %36 : vector<16x16xf32>
    %39 = arith.select %1, %26, %16 : vector<16x16xf32>
    %40 = arith.select %1, %32, %18 : vector<16x16xf32>
    %41 = arith.select %1, %38, %20 : vector<16x16xf32>
    %42 = vector.broadcast %11 : f32 to vector<16x16xf32>
    %43 = arith.mulf %42, %39 : vector<16x16xf32>
    %cst_23 = arith.constant 1.000000e+00 : f32
    %44 = arith.subf %cst_23, %11 : f32
    %45 = arith.mulf %44, %14 : f32
    %46 = vector.broadcast %45 : f32 to vector<16x16xf32>
    %47 = arith.addf %43, %46 : vector<16x16xf32>
    %cst_24 = arith.constant 0.000000e+00 : f32
    %cst_25 = arith.constant 1.000000e+00 : f32
    %48 = vector.broadcast %cst_24 : f32 to vector<16x16xf32>
    %49 = arith.maximumf %48, %47 : vector<16x16xf32>
    %50 = vector.broadcast %cst_25 : f32 to vector<16x16xf32>
    %51 = arith.minimumf %50, %49 : vector<16x16xf32>
    %52 = vector.broadcast %11 : f32 to vector<16x16xf32>
    %53 = arith.mulf %52, %40 : vector<16x16xf32>
    %cst_26 = arith.constant 1.000000e+00 : f32
    %54 = arith.subf %cst_26, %11 : f32
    %55 = arith.mulf %54, %14 : f32
    %56 = vector.broadcast %55 : f32 to vector<16x16xf32>
    %57 = arith.addf %53, %56 : vector<16x16xf32>
    %cst_27 = arith.constant 0.000000e+00 : f32
    %cst_28 = arith.constant 1.000000e+00 : f32
    %58 = vector.broadcast %cst_27 : f32 to vector<16x16xf32>
    %59 = arith.maximumf %58, %57 : vector<16x16xf32>
    %60 = vector.broadcast %cst_28 : f32 to vector<16x16xf32>
    %61 = arith.minimumf %60, %59 : vector<16x16xf32>
    %62 = vector.broadcast %11 : f32 to vector<16x16xf32>
    %63 = arith.mulf %62, %41 : vector<16x16xf32>
    %cst_29 = arith.constant 1.000000e+00 : f32
    %64 = arith.subf %cst_29, %11 : f32
    %65 = arith.mulf %64, %14 : f32
    %66 = vector.broadcast %65 : f32 to vector<16x16xf32>
    %67 = arith.addf %63, %66 : vector<16x16xf32>
    %cst_30 = arith.constant 0.000000e+00 : f32
    %cst_31 = arith.constant 1.000000e+00 : f32
    %68 = vector.broadcast %cst_30 : f32 to vector<16x16xf32>
    %69 = arith.maximumf %68, %67 : vector<16x16xf32>
    %70 = vector.broadcast %cst_31 : f32 to vector<16x16xf32>
    %71 = arith.minimumf %70, %69 : vector<16x16xf32>
    %72 = arith.select %3, %51, %39 : vector<16x16xf32>
    %73 = arith.select %3, %61, %40 : vector<16x16xf32>
    %74 = arith.select %3, %71, %41 : vector<16x16xf32>
    %cst_32 = arith.constant 2.989000e-01 : f32
    %75 = vector.broadcast %cst_32 : f32 to vector<16x16xf32>
    %76 = arith.mulf %75, %72 : vector<16x16xf32>
    %cst_33 = arith.constant 5.870000e-01 : f32
    %77 = vector.broadcast %cst_33 : f32 to vector<16x16xf32>
    %78 = arith.mulf %77, %73 : vector<16x16xf32>
    %79 = arith.addf %76, %78 : vector<16x16xf32>
    %cst_34 = arith.constant 1.140000e-01 : f32
    %80 = vector.broadcast %cst_34 : f32 to vector<16x16xf32>
    %81 = arith.mulf %80, %74 : vector<16x16xf32>
    %82 = arith.addf %79, %81 : vector<16x16xf32>
    %83 = vector.broadcast %12 : f32 to vector<16x16xf32>
    %84 = arith.mulf %83, %72 : vector<16x16xf32>
    %cst_35 = arith.constant 1.000000e+00 : f32
    %85 = arith.subf %cst_35, %12 : f32
    %86 = vector.broadcast %85 : f32 to vector<16x16xf32>
    %87 = arith.mulf %86, %82 : vector<16x16xf32>
    %88 = arith.addf %84, %87 : vector<16x16xf32>
    %cst_36 = arith.constant 0.000000e+00 : f32
    %cst_37 = arith.constant 1.000000e+00 : f32
    %89 = vector.broadcast %cst_36 : f32 to vector<16x16xf32>
    %90 = arith.maximumf %89, %88 : vector<16x16xf32>
    %91 = vector.broadcast %cst_37 : f32 to vector<16x16xf32>
    %92 = arith.minimumf %91, %90 : vector<16x16xf32>
    %93 = vector.broadcast %12 : f32 to vector<16x16xf32>
    %94 = arith.mulf %93, %73 : vector<16x16xf32>
    %cst_38 = arith.constant 1.000000e+00 : f32
    %95 = arith.subf %cst_38, %12 : f32
    %96 = vector.broadcast %95 : f32 to vector<16x16xf32>
    %97 = arith.mulf %96, %82 : vector<16x16xf32>
    %98 = arith.addf %94, %97 : vector<16x16xf32>
    %cst_39 = arith.constant 0.000000e+00 : f32
    %cst_40 = arith.constant 1.000000e+00 : f32
    %99 = vector.broadcast %cst_39 : f32 to vector<16x16xf32>
    %100 = arith.maximumf %99, %98 : vector<16x16xf32>
    %101 = vector.broadcast %cst_40 : f32 to vector<16x16xf32>
    %102 = arith.minimumf %101, %100 : vector<16x16xf32>
    %103 = vector.broadcast %12 : f32 to vector<16x16xf32>
    %104 = arith.mulf %103, %74 : vector<16x16xf32>
    %cst_41 = arith.constant 1.000000e+00 : f32
    %105 = arith.subf %cst_41, %12 : f32
    %106 = vector.broadcast %105 : f32 to vector<16x16xf32>
    %107 = arith.mulf %106, %82 : vector<16x16xf32>
    %108 = arith.addf %104, %107 : vector<16x16xf32>
    %cst_42 = arith.constant 0.000000e+00 : f32
    %cst_43 = arith.constant 1.000000e+00 : f32
    %109 = vector.broadcast %cst_42 : f32 to vector<16x16xf32>
    %110 = arith.maximumf %109, %108 : vector<16x16xf32>
    %111 = vector.broadcast %cst_43 : f32 to vector<16x16xf32>
    %112 = arith.minimumf %111, %110 : vector<16x16xf32>
    %113 = arith.select %5, %92, %72 : vector<16x16xf32>
    %114 = arith.select %5, %102, %73 : vector<16x16xf32>
    %115 = arith.select %5, %112, %74 : vector<16x16xf32>
    %116 = arith.extui %7 : i1 to i32
    %c0_i32_44 = arith.constant 0 : i32
    %117 = arith.cmpi ne, %116, %c0_i32_44 : i32
    scf.if %117 {
      %121 = arith.maximumf %113, %114 : vector<16x16xf32>
      %122 = arith.maximumf %121, %115 : vector<16x16xf32>
      %123 = arith.minimumf %113, %114 : vector<16x16xf32>
      %124 = arith.minimumf %123, %115 : vector<16x16xf32>
      %125 = arith.cmpf oeq, %122, %124 : vector<16x16xf32>
      %126 = arith.subf %122, %124 : vector<16x16xf32>
      %cst_46 = arith.constant 1.000000e+00 : f32
      %127 = vector.broadcast %cst_46 : f32 to vector<16x16xf32>
      %128 = arith.select %125, %127, %122 : vector<16x16xi1>, vector<16x16xf32>
      %129 = arith.divf %126, %128 : vector<16x16xf32>
      %130 = arith.select %125, %127, %126 : vector<16x16xi1>, vector<16x16xf32>
      %cst_47 = arith.constant 1.000000e+00 : f32
      %131 = vector.broadcast %cst_47 : f32 to vector<16x16xf32>
      %132 = arith.divf %131, %130 : vector<16x16xf32>
      %133 = arith.subf %122, %113 : vector<16x16xf32>
      %134 = arith.mulf %133, %132 : vector<16x16xf32>
      %135 = arith.subf %122, %114 : vector<16x16xf32>
      %136 = arith.mulf %135, %132 : vector<16x16xf32>
      %137 = arith.subf %122, %115 : vector<16x16xf32>
      %138 = arith.mulf %137, %132 : vector<16x16xf32>
      %139 = arith.cmpf oeq, %122, %113 : vector<16x16xf32>
      %140 = arith.subf %138, %136 : vector<16x16xf32>
      %cst_48 = arith.constant 0.000000e+00 : f32
      %141 = vector.broadcast %cst_48 : f32 to vector<16x16xf32>
      %142 = arith.select %139, %140, %141 : vector<16x16xi1>, vector<16x16xf32>
      %143 = arith.cmpf oeq, %122, %114 : vector<16x16xf32>
      %144 = arith.cmpf one, %122, %113 : vector<16x16xf32>
      %145 = arith.andi %143, %144 : vector<16x16xi1>
      %cst_49 = arith.constant 2.000000e+00 : f32
      %146 = vector.broadcast %cst_49 : f32 to vector<16x16xf32>
      %147 = arith.addf %146, %134 : vector<16x16xf32>
      %148 = arith.subf %147, %138 : vector<16x16xf32>
      %cst_50 = arith.constant 0.000000e+00 : f32
      %149 = vector.broadcast %cst_50 : f32 to vector<16x16xf32>
      %150 = arith.select %145, %148, %149 : vector<16x16xi1>, vector<16x16xf32>
      %151 = arith.cmpf one, %122, %114 : vector<16x16xf32>
      %152 = arith.cmpf one, %122, %113 : vector<16x16xf32>
      %153 = arith.andi %151, %152 : vector<16x16xi1>
      %cst_51 = arith.constant 4.000000e+00 : f32
      %154 = vector.broadcast %cst_51 : f32 to vector<16x16xf32>
      %155 = arith.addf %154, %136 : vector<16x16xf32>
      %156 = arith.subf %155, %134 : vector<16x16xf32>
      %cst_52 = arith.constant 0.000000e+00 : f32
      %157 = vector.broadcast %cst_52 : f32 to vector<16x16xf32>
      %158 = arith.select %153, %156, %157 : vector<16x16xi1>, vector<16x16xf32>
      %159 = arith.addf %142, %150 : vector<16x16xf32>
      %160 = arith.addf %159, %158 : vector<16x16xf32>
      %cst_53 = arith.constant 0.166666672 : f32
      %161 = vector.broadcast %cst_53 : f32 to vector<16x16xf32>
      %162 = arith.mulf %160, %161 : vector<16x16xf32>
      %cst_54 = arith.constant 1.000000e+00 : f32
      %163 = vector.broadcast %cst_54 : f32 to vector<16x16xf32>
      %164 = arith.addf %162, %163 : vector<16x16xf32>
      %165 = math.floor %164 : vector<16x16xf32>
      %166 = arith.subf %164, %165 : vector<16x16xf32>
      %167 = vector.broadcast %13 : f32 to vector<16x16xf32>
      %168 = arith.addf %166, %167 : vector<16x16xf32>
      %169 = math.floor %168 : vector<16x16xf32>
      %170 = arith.subf %168, %169 : vector<16x16xf32>
      %cst_55 = arith.constant 6.000000e+00 : f32
      %171 = vector.broadcast %cst_55 : f32 to vector<16x16xf32>
      %172 = arith.mulf %170, %171 : vector<16x16xf32>
      %cst_56 = arith.constant 5.000000e+00 : f32
      %173 = vector.broadcast %cst_56 : f32 to vector<16x16xf32>
      %174 = arith.addf %173, %172 : vector<16x16xf32>
      %cst_57 = arith.constant 6.000000e+00 : f32
      %175 = vector.broadcast %cst_57 : f32 to vector<16x16xf32>
      %176 = arith.cmpf oge, %174, %175 : vector<16x16xf32>
      %cst_58 = arith.constant 6.000000e+00 : f32
      %cst_59 = arith.constant 0.000000e+00 : f32
      %177 = vector.broadcast %cst_58 : f32 to vector<16x16xf32>
      %178 = vector.broadcast %cst_59 : f32 to vector<16x16xf32>
      %179 = arith.select %176, %177, %178 : vector<16x16xi1>, vector<16x16xf32>
      %180 = arith.subf %174, %179 : vector<16x16xf32>
      %cst_60 = arith.constant 4.000000e+00 : f32
      %181 = vector.broadcast %cst_60 : f32 to vector<16x16xf32>
      %182 = arith.subf %181, %180 : vector<16x16xf32>
      %183 = arith.minimumf %180, %182 : vector<16x16xf32>
      %cst_61 = arith.constant 0.000000e+00 : f32
      %cst_62 = arith.constant 1.000000e+00 : f32
      %184 = vector.broadcast %cst_61 : f32 to vector<16x16xf32>
      %185 = arith.maximumf %184, %183 : vector<16x16xf32>
      %186 = vector.broadcast %cst_62 : f32 to vector<16x16xf32>
      %187 = arith.minimumf %186, %185 : vector<16x16xf32>
      %188 = arith.mulf %122, %129 : vector<16x16xf32>
      %189 = arith.mulf %188, %187 : vector<16x16xf32>
      %190 = arith.subf %122, %189 : vector<16x16xf32>
      %cst_63 = arith.constant 0.000000e+00 : f32
      %cst_64 = arith.constant 1.000000e+00 : f32
      %191 = vector.broadcast %cst_63 : f32 to vector<16x16xf32>
      %192 = arith.maximumf %191, %190 : vector<16x16xf32>
      %193 = vector.broadcast %cst_64 : f32 to vector<16x16xf32>
      %194 = arith.minimumf %193, %192 : vector<16x16xf32>
      %cst_65 = arith.constant 3.000000e+00 : f32
      %195 = vector.broadcast %cst_65 : f32 to vector<16x16xf32>
      %196 = arith.addf %195, %172 : vector<16x16xf32>
      %cst_66 = arith.constant 6.000000e+00 : f32
      %197 = vector.broadcast %cst_66 : f32 to vector<16x16xf32>
      %198 = arith.cmpf oge, %196, %197 : vector<16x16xf32>
      %cst_67 = arith.constant 6.000000e+00 : f32
      %cst_68 = arith.constant 0.000000e+00 : f32
      %199 = vector.broadcast %cst_67 : f32 to vector<16x16xf32>
      %200 = vector.broadcast %cst_68 : f32 to vector<16x16xf32>
      %201 = arith.select %198, %199, %200 : vector<16x16xi1>, vector<16x16xf32>
      %202 = arith.subf %196, %201 : vector<16x16xf32>
      %cst_69 = arith.constant 4.000000e+00 : f32
      %203 = vector.broadcast %cst_69 : f32 to vector<16x16xf32>
      %204 = arith.subf %203, %202 : vector<16x16xf32>
      %205 = arith.minimumf %202, %204 : vector<16x16xf32>
      %cst_70 = arith.constant 0.000000e+00 : f32
      %cst_71 = arith.constant 1.000000e+00 : f32
      %206 = vector.broadcast %cst_70 : f32 to vector<16x16xf32>
      %207 = arith.maximumf %206, %205 : vector<16x16xf32>
      %208 = vector.broadcast %cst_71 : f32 to vector<16x16xf32>
      %209 = arith.minimumf %208, %207 : vector<16x16xf32>
      %210 = arith.mulf %122, %129 : vector<16x16xf32>
      %211 = arith.mulf %210, %209 : vector<16x16xf32>
      %212 = arith.subf %122, %211 : vector<16x16xf32>
      %cst_72 = arith.constant 0.000000e+00 : f32
      %cst_73 = arith.constant 1.000000e+00 : f32
      %213 = vector.broadcast %cst_72 : f32 to vector<16x16xf32>
      %214 = arith.maximumf %213, %212 : vector<16x16xf32>
      %215 = vector.broadcast %cst_73 : f32 to vector<16x16xf32>
      %216 = arith.minimumf %215, %214 : vector<16x16xf32>
      %cst_74 = arith.constant 1.000000e+00 : f32
      %217 = vector.broadcast %cst_74 : f32 to vector<16x16xf32>
      %218 = arith.addf %217, %172 : vector<16x16xf32>
      %cst_75 = arith.constant 6.000000e+00 : f32
      %219 = vector.broadcast %cst_75 : f32 to vector<16x16xf32>
      %220 = arith.cmpf oge, %218, %219 : vector<16x16xf32>
      %cst_76 = arith.constant 6.000000e+00 : f32
      %cst_77 = arith.constant 0.000000e+00 : f32
      %221 = vector.broadcast %cst_76 : f32 to vector<16x16xf32>
      %222 = vector.broadcast %cst_77 : f32 to vector<16x16xf32>
      %223 = arith.select %220, %221, %222 : vector<16x16xi1>, vector<16x16xf32>
      %224 = arith.subf %218, %223 : vector<16x16xf32>
      %cst_78 = arith.constant 4.000000e+00 : f32
      %225 = vector.broadcast %cst_78 : f32 to vector<16x16xf32>
      %226 = arith.subf %225, %224 : vector<16x16xf32>
      %227 = arith.minimumf %224, %226 : vector<16x16xf32>
      %cst_79 = arith.constant 0.000000e+00 : f32
      %cst_80 = arith.constant 1.000000e+00 : f32
      %228 = vector.broadcast %cst_79 : f32 to vector<16x16xf32>
      %229 = arith.maximumf %228, %227 : vector<16x16xf32>
      %230 = vector.broadcast %cst_80 : f32 to vector<16x16xf32>
      %231 = arith.minimumf %230, %229 : vector<16x16xf32>
      %232 = arith.mulf %122, %129 : vector<16x16xf32>
      %233 = arith.mulf %232, %231 : vector<16x16xf32>
      %234 = arith.subf %122, %233 : vector<16x16xf32>
      %cst_81 = arith.constant 0.000000e+00 : f32
      %cst_82 = arith.constant 1.000000e+00 : f32
      %235 = vector.broadcast %cst_81 : f32 to vector<16x16xf32>
      %236 = arith.maximumf %235, %234 : vector<16x16xf32>
      %237 = vector.broadcast %cst_82 : f32 to vector<16x16xf32>
      %238 = arith.minimumf %237, %236 : vector<16x16xf32>
      %239 = vector.broadcast %11 : f32 to vector<16x16xf32>
      %240 = arith.mulf %239, %194 : vector<16x16xf32>
      %cst_83 = arith.constant 1.000000e+00 : f32
      %241 = arith.subf %cst_83, %11 : f32
      %242 = arith.mulf %241, %14 : f32
      %243 = vector.broadcast %242 : f32 to vector<16x16xf32>
      %244 = arith.addf %240, %243 : vector<16x16xf32>
      %cst_84 = arith.constant 0.000000e+00 : f32
      %cst_85 = arith.constant 1.000000e+00 : f32
      %245 = vector.broadcast %cst_84 : f32 to vector<16x16xf32>
      %246 = arith.maximumf %245, %244 : vector<16x16xf32>
      %247 = vector.broadcast %cst_85 : f32 to vector<16x16xf32>
      %248 = arith.minimumf %247, %246 : vector<16x16xf32>
      %249 = vector.broadcast %11 : f32 to vector<16x16xf32>
      %250 = arith.mulf %249, %216 : vector<16x16xf32>
      %cst_86 = arith.constant 1.000000e+00 : f32
      %251 = arith.subf %cst_86, %11 : f32
      %252 = arith.mulf %251, %14 : f32
      %253 = vector.broadcast %252 : f32 to vector<16x16xf32>
      %254 = arith.addf %250, %253 : vector<16x16xf32>
      %cst_87 = arith.constant 0.000000e+00 : f32
      %cst_88 = arith.constant 1.000000e+00 : f32
      %255 = vector.broadcast %cst_87 : f32 to vector<16x16xf32>
      %256 = arith.maximumf %255, %254 : vector<16x16xf32>
      %257 = vector.broadcast %cst_88 : f32 to vector<16x16xf32>
      %258 = arith.minimumf %257, %256 : vector<16x16xf32>
      %259 = vector.broadcast %11 : f32 to vector<16x16xf32>
      %260 = arith.mulf %259, %238 : vector<16x16xf32>
      %cst_89 = arith.constant 1.000000e+00 : f32
      %261 = arith.subf %cst_89, %11 : f32
      %262 = arith.mulf %261, %14 : f32
      %263 = vector.broadcast %262 : f32 to vector<16x16xf32>
      %264 = arith.addf %260, %263 : vector<16x16xf32>
      %cst_90 = arith.constant 0.000000e+00 : f32
      %cst_91 = arith.constant 1.000000e+00 : f32
      %265 = vector.broadcast %cst_90 : f32 to vector<16x16xf32>
      %266 = arith.maximumf %265, %264 : vector<16x16xf32>
      %267 = vector.broadcast %cst_91 : f32 to vector<16x16xf32>
      %268 = arith.minimumf %267, %266 : vector<16x16xf32>
      %269 = arith.select %9, %248, %194 : vector<16x16xf32>
      %270 = arith.select %9, %258, %216 : vector<16x16xf32>
      %271 = arith.select %9, %268, %238 : vector<16x16xf32>
      %c0_92 = arith.constant 0 : index
      %c0_93 = arith.constant 0 : index
      %c0_94 = arith.constant 0 : index
      %272 = vector.load %arg4[%c0_92, %c0_93, %c0_94] : memref<3x16x16xf32, #tpu.memory_space<vmem>>, vector<1x16x16xf32>
      %273 = vector.shape_cast %272 : vector<1x16x16xf32> to vector<16x16xf32>
      %274 = vector.shape_cast %269 : vector<16x16xf32> to vector<1x16x16xf32>
      tpu.vector_store %arg4[%c0_92, %c0_93, %c0_94], %274 {strides = array<i32>} : memref<3x16x16xf32, #tpu.memory_space<vmem>>, vector<1x16x16xf32>,
      %c1_95 = arith.constant 1 : index
      %c0_96 = arith.constant 0 : index
      %c0_97 = arith.constant 0 : index
      %275 = vector.load %arg4[%c1_95, %c0_96, %c0_97] : memref<3x16x16xf32, #tpu.memory_space<vmem>>, vector<1x16x16xf32>
      %276 = vector.shape_cast %275 : vector<1x16x16xf32> to vector<16x16xf32>
      %277 = vector.shape_cast %270 : vector<16x16xf32> to vector<1x16x16xf32>
      tpu.vector_store %arg4[%c1_95, %c0_96, %c0_97], %277 {strides = array<i32>} : memref<3x16x16xf32, #tpu.memory_space<vmem>>, vector<1x16x16xf32>,
      %c2_98 = arith.constant 2 : index
      %c0_99 = arith.constant 0 : index
      %c0_100 = arith.constant 0 : index
      %278 = vector.load %arg4[%c2_98, %c0_99, %c0_100] : memref<3x16x16xf32, #tpu.memory_space<vmem>>, vector<1x16x16xf32>
      %279 = vector.shape_cast %278 : vector<1x16x16xf32> to vector<16x16xf32>
      %280 = vector.shape_cast %271 : vector<16x16xf32> to vector<1x16x16xf32>
      tpu.vector_store %arg4[%c2_98, %c0_99, %c0_100], %280 {strides = array<i32>} : memref<3x16x16xf32, #tpu.memory_space<vmem>>, vector<1x16x16xf32>,
    } else {
    }
    %true = arith.constant true
    %118 = arith.xori %7, %true : i1
    %119 = arith.extui %118 : i1 to i32
    %c0_i32_45 = arith.constant 0 : i32
    %120 = arith.cmpi ne, %119, %c0_i32_45 : i32
    scf.if %120 {
      %121 = vector.broadcast %11 : f32 to vector<16x16xf32>
      %122 = arith.mulf %121, %113 : vector<16x16xf32>
      %cst_46 = arith.constant 1.000000e+00 : f32
      %123 = arith.subf %cst_46, %11 : f32
      %124 = arith.mulf %123, %14 : f32
      %125 = vector.broadcast %124 : f32 to vector<16x16xf32>
      %126 = arith.addf %122, %125 : vector<16x16xf32>
      %cst_47 = arith.constant 0.000000e+00 : f32
      %cst_48 = arith.constant 1.000000e+00 : f32
      %127 = vector.broadcast %cst_47 : f32 to vector<16x16xf32>
      %128 = arith.maximumf %127, %126 : vector<16x16xf32>
      %129 = vector.broadcast %cst_48 : f32 to vector<16x16xf32>
      %130 = arith.minimumf %129, %128 : vector<16x16xf32>
      %131 = vector.broadcast %11 : f32 to vector<16x16xf32>
      %132 = arith.mulf %131, %114 : vector<16x16xf32>
      %cst_49 = arith.constant 1.000000e+00 : f32
      %133 = arith.subf %cst_49, %11 : f32
      %134 = arith.mulf %133, %14 : f32
      %135 = vector.broadcast %134 : f32 to vector<16x16xf32>
      %136 = arith.addf %132, %135 : vector<16x16xf32>
      %cst_50 = arith.constant 0.000000e+00 : f32
      %cst_51 = arith.constant 1.000000e+00 : f32
      %137 = vector.broadcast %cst_50 : f32 to vector<16x16xf32>
      %138 = arith.maximumf %137, %136 : vector<16x16xf32>
      %139 = vector.broadcast %cst_51 : f32 to vector<16x16xf32>
      %140 = arith.minimumf %139, %138 : vector<16x16xf32>
      %141 = vector.broadcast %11 : f32 to vector<16x16xf32>
      %142 = arith.mulf %141, %115 : vector<16x16xf32>
      %cst_52 = arith.constant 1.000000e+00 : f32
      %143 = arith.subf %cst_52, %11 : f32
      %144 = arith.mulf %143, %14 : f32
      %145 = vector.broadcast %144 : f32 to vector<16x16xf32>
      %146 = arith.addf %142, %145 : vector<16x16xf32>
      %cst_53 = arith.constant 0.000000e+00 : f32
      %cst_54 = arith.constant 1.000000e+00 : f32
      %147 = vector.broadcast %cst_53 : f32 to vector<16x16xf32>
      %148 = arith.maximumf %147, %146 : vector<16x16xf32>
      %149 = vector.broadcast %cst_54 : f32 to vector<16x16xf32>
      %150 = arith.minimumf %149, %148 : vector<16x16xf32>
      %151 = arith.select %9, %130, %113 : vector<16x16xf32>
      %152 = arith.select %9, %140, %114 : vector<16x16xf32>
      %153 = arith.select %9, %150, %115 : vector<16x16xf32>
      %c0_55 = arith.constant 0 : index
      %c0_56 = arith.constant 0 : index
      %c0_57 = arith.constant 0 : index
      %154 = vector.load %arg4[%c0_55, %c0_56, %c0_57] : memref<3x16x16xf32, #tpu.memory_space<vmem>>, vector<1x16x16xf32>
      %155 = vector.shape_cast %154 : vector<1x16x16xf32> to vector<16x16xf32>
      %156 = vector.shape_cast %151 : vector<16x16xf32> to vector<1x16x16xf32>
      tpu.vector_store %arg4[%c0_55, %c0_56, %c0_57], %156 {strides = array<i32>} : memref<3x16x16xf32, #tpu.memory_space<vmem>>, vector<1x16x16xf32>,
      %c1_58 = arith.constant 1 : index
      %c0_59 = arith.constant 0 : index
      %c0_60 = arith.constant 0 : index
      %157 = vector.load %arg4[%c1_58, %c0_59, %c0_60] : memref<3x16x16xf32, #tpu.memory_space<vmem>>, vector<1x16x16xf32>
      %158 = vector.shape_cast %157 : vector<1x16x16xf32> to vector<16x16xf32>
      %159 = vector.shape_cast %152 : vector<16x16xf32> to vector<1x16x16xf32>
      tpu.vector_store %arg4[%c1_58, %c0_59, %c0_60], %159 {strides = array<i32>} : memref<3x16x16xf32, #tpu.memory_space<vmem>>, vector<1x16x16xf32>,
      %c2_61 = arith.constant 2 : index
      %c0_62 = arith.constant 0 : index
      %c0_63 = arith.constant 0 : index
      %160 = vector.load %arg4[%c2_61, %c0_62, %c0_63] : memref<3x16x16xf32, #tpu.memory_space<vmem>>, vector<1x16x16xf32>
      %161 = vector.shape_cast %160 : vector<1x16x16xf32> to vector<16x16xf32>
      %162 = vector.shape_cast %153 : vector<16x16xf32> to vector<1x16x16xf32>
      tpu.vector_store %arg4[%c2_61, %c0_62, %c0_63], %162 {strides = array<i32>} : memref<3x16x16xf32, #tpu.memory_space<vmem>>, vector<1x16x16xf32>,
    } else {
    }
    return
  }
  func.func @transform_0(%arg0: i32, %arg1: memref<8xi32, #tpu.memory_space<smem>>, %arg2: memref<8xf32, #tpu.memory_space<smem>>) -> (i32, i32, i32) {
    %c0_i32 = arith.constant 0 : i32
    %c0_i32_0 = arith.constant 0 : i32
    %c0_i32_1 = arith.constant 0 : i32
    return %c0_i32, %arg0, %c0_i32_0 : i32, i32, i32
  }
  func.func @transform_1(%arg0: i32, %arg1: memref<8xi32, #tpu.memory_space<smem>>, %arg2: memref<8xf32, #tpu.memory_space<smem>>) -> (i32, i32, i32) {
    %c0_i32 = arith.constant 0 : i32
    %c0_i32_0 = arith.constant 0 : i32
    %c0_i32_1 = arith.constant 0 : i32
    return %c0_i32, %arg0, %c0_i32_0 : i32, i32, i32
  }
}

</mosaic_0001>

<bundles_post_ra>
// kernel: _color_jitter_with_mean_call.2
= control target key start
LH: loop header
LB: loop body
LE: loop exit
PB: predicated region body
PF: predicated region fallthrough
CT: control target
= control target key end

     0   :  { %s662_s0 = inlined_call_operand.hbm [shape: s32[8], index: 0, kind: input, shape index: {}]   ;;  %s663_s2 = inlined_call_operand.hbm [shape: f32[3,16,16], index: 2, kind: input, shape index: {}]   ;;  %s664_s3 = inlined_call_operand.vmem [shape: f32[8,16], index: 3, kind: output, shape index: {}]   ;;  %s665_s1 = inlined_call_operand.vmem [shape: f32[8], index: 1, kind: input, shape index: {}]  }
   0x1   :  { %s380_s14 = scalar_lea.hbm %s662_s0, 16 }
   0x2   :  { %p381_p0 = scmp.ne.s32.totalorder %s662_s0, %s380_s14  ;;  %p384_p1 = scmp.lt.u32.totalorder %s380_s14, %s662_s0 }
   0x4   :  { %p386_p2 = pnand %p384_p1, %p381_p0 }
   0x6   :  { %389 = shalt.err (!%p386_p2)  }
   0x7   :  { %s428_s19 = smov [#allocation3]   ;;  %s10_s24 = sshll.u32 %s665_s1, 4  ;;  %s11_s24 = int_to_ptr.vmem [resolvable:$true] %s10_s24 }
   0x8   :  { %9 = dma.hbm_to_smem %s662_s0, 16, %s428_s19, [#allocation2] }
   0x9   :  { %s390_s25 = scalar_lea.vmem %s11_s24, 16  ;;  %p395_p4 = scmp.lt.s32.totalorder %s11_s24, %s11_s24 }
   0xa   :  { %p391_p3 = scmp.ne.s32.totalorder %s11_s24, %s390_s25  ;;  %p396_p5 = scmp.lt.s32.totalorder %s390_s25, %s390_s25 }
   0xc   :  { %p397_p6 = por %p396_p5, %p395_p4 }
   0xe   :  { %p398_p7 = pnand %p397_p6, %p391_p3 }
  0x10   :  { %401 = shalt.err (!%p398_p7)  }
  0x11   :  { %s429_s26 = smov [#allocation4]  }
  0x12   :  { %13 = dma.vmem_to_smem %s11_s24, 16, %s429_s26, [#allocation2] }
  0x13   :  { %424 = dma.done.wait [#allocation2], 32 }
  0x14   :  { %425 = vsyncadd [#allocation2], 4294967264 }
  0x15   :  { %15 = sfence }
  0x16   :  { %16 = vsyncpa [#allocation6], 0  ;;  %s430_s27 = smov [#allocation5]   ;;  %s402_s1 = scalar_lea.hbm %s663_s2, 768 }
  0x17   :  { %s22_s0 = sshll.u32 %s430_s27, 4  ;;  %p403_p8 = scmp.ne.s32.totalorder %s663_s2, %s402_s1  ;;  %s23_s0 = int_to_ptr.vmem [resolvable:$true] %s22_s0 }
  0x18   :  { %p406_p9 = scmp.lt.u32.totalorder %s402_s1, %s663_s2 }
  0x1a   :  { %p408_p10 = pnand %p406_p9, %p403_p8 }
  0x1c   :  { %411 = shalt.err (!%p408_p10)
}
  0x1d   :  { %s412_s7 = scalar_lea.vmem %s23_s0, 768  ;;  %p417_p12 = scmp.lt.s32.totalorder %s23_s0, %s23_s0 }
  0x1e   :  { %p413_p11 = scmp.ne.s32.totalorder %s23_s0, %s412_s7  ;;  %p418_p13 = scmp.lt.s32.totalorder %s412_s7, %s412_s7 }
  0x20   :  { %p419_p0 = por %p418_p13, %p417_p12 }
  0x22   :  { %p420_p1 = pnand %p419_p0, %p413_p11 }
  0x24   :  { %423 = shalt.err (!%p420_p1)
}
  0x25   :  { %s431_s8 = smov 128   ;;  %s432_s9 = smov 8  }
  0x26   :  { %28 = dma.hbm_to_vmem [thread:$0]  %s663_s2, 768, %s23_s0, [#allocation6], %s431_s8, %s431_s8, %s432_s9  }
  0x27   :  { %426 = dma.done.wait [#allocation6], 768  }
  0x28   :  { %427 = vsyncadd [#allocation6], 4294966528  ;;  %s32_s12 = sld [smem:[#allocation3]]  ;;  %s482_s13 = sld [smem:[#allocation3 + $0x4]]  ;;  %v56_v0 = vld [vmem:[#allocation5] sm:$0xff]  ;;  %v57_v1 = vld [vmem:[#allocation5 + $0x8] sm:$0xff] }
  0x29   :  { %s361_s14 = sld [smem:[#allocation3 + $0x3]]  ;;  %s44_s15 = sld [smem:[#allocation4]]  ;;  %v59_v2 = vld [vmem:[#allocation5 + $0x10] sm:$0xff]  ;;  %v60_v3 = vld [vmem:[#allocation5 + $0x18] sm:$0xff]  ;;  %v62_v4 = vld [vmem:[#allocation5 + $0x20] sm:$0xff] }
  0x2a   :  { %s484_s16 = sld [smem:[#allocation4 + $0x3]]  ;;  %s486_s17 = sld [smem:[#allocation3 + $0x2]]  ;;  %v63_v5 = vld [vmem:[#allocation5 + $0x28] sm:$0xff] }
  0x2b   :  { %s488_s18 = sld [smem:[#allocation4 + $0x2]] }
  0x2e   :  { %p33_p2 = scmp.gt.s32.totalorder %s32_s12, 0  ;;  %p35_p3 = scmp.gt.s32.totalorder %s482_s13, 0 }
  0x2f   :  { %p41_p4 = scmp.gt.s32.totalorder %s361_s14, 0  ;;  %v64_v6 = vstv %s44_s15 }
  0x30   :  { %s83_s2 = scalar_select %p33_p2, 1, 0  ;;  %v65_v7 = vmul.f32 %v64_v6, %v56_v0  ;;  %v66_v8 = vmul.f32 %v64_v6, %v57_v1  ;;  %v71_v9 = vmul.f32 %v64_v6, %v59_v2  ;;  %v72_v10 = vmul.f32 %v64_v6, %v60_v3 }
  0x31   :  { %p493_p5 = pnand %p41_p4, %p35_p3  ;;  %v77_v11 = vmul.f32 %v64_v6, %v62_v4  ;;  %v78_v12 = vmul.f32 %v64_v6, %v63_v5  ;;  %p37_p6 = scmp.gt.s32.totalorder %s486_s17, 0  ;;  %v102_v37 = vstv %s488_s18 }
  0x32   :  { %v84_v13 = vstv %s83_s2  ;;  %v67_v14 = vmax.f32 %v65_v7, 0.0  ;;  %v68_v15 = vmax.f32 %v66_v8, 0.0  ;;  %v73_v16 = vmax.f32 %v71_v9, 0.0  ;;  %s105_s21 = ssub.f32 1.0, %s488_s18 }
  0x33   :  { %v74_v17 = vmax.f32 %v72_v10, 0.0  ;;  %v79_v18 = vmax.f32 %v77_v11, 0.0  ;;  %v80_v19 = vmax.f32 %v78_v12, 0.0  ;;  %vm85_vm0 = vcmp.eq.s32.totalorder %v84_v13, 1  ;;  %p502_p7 = pnand %p37_p6, %p35_p3 }
  0x34   :  { %v69_v20 = vmin.f32 %v67_v14, 1.0  ;;  %v70_v21 = vmin.f32 %v68_v15, 1.0  ;;  %v75_v22 = vmin.f32 %v73_v16, 1.0  ;;  %v106_v43 = vstv %s105_s21 }
  0x35   :  { %v76_v23 = vmin.f32 %v74_v17, 1.0  ;;  %v81_v24 = vmin.f32 %v79_v18, 1.0  ;;  %v82_v25 = vmin.f32 %v80_v19, 1.0  ;;  %s364_s22 = scalar_select %p502_p7, 0, 1 }
  0x36   :  { %v86_v26 = vsel %vm85_vm0, %v69_v20, %v56_v0  ;;  %v87_v27 = vsel %vm85_vm0, %v70_v21, %v57_v1  ;;  %v88_v28 = vsel %vm85_vm0, %v75_v22, %v59_v2  ;;  %vm313_vm2 = vcmask (!%p493_p5), 130048  }
  0x37   :  { %v89_v29 = vsel %vm85_vm0, %v76_v23, %v60_v3  ;;  %v90_v30 = vsel %vm85_vm0, %v81_v24, %v62_v4  ;;  %v91_v31 = vsel %vm85_vm0, %v82_v25, %v63_v5  ;;  %v92_v32 = vmul.f32 0.2989, %v86_v26 }
  0x38   :  { %v93_v33 = vmul.f32 0.2989, %v87_v27  ;;  %v94_v34 = vmul.f32 0.587, %v88_v28  ;;  %v95_v35 = vmul.f32 0.587, %v89_v29  ;;  %v103_v41 = vmul.f32 %v102_v37, %v86_v26 }
  0x39   :  { %v98_v36 = vmul.f32 0.114, %v90_v30  ;;  %v99_v38 = vmul.f32 0.114, %v91_v31  ;;  %v104_v42 = vmul.f32 %v102_v37, %v87_v27  ;;  %v115_v46 = vmul.f32 %v102_v37, %v88_v28 }
  0x3a   :  { %v96_v39 = vadd.f32 %v94_v34, %v92_v32  ;;  %v97_v40 = vadd.f32 %v95_v35, %v93_v33  ;;  %v116_v47 = vmul.f32 %v102_v37, %v89_v29  ;;  %v123_v48 = vmul.f32 %v102_v37, %v90_v30 }
  0x3b   :  { %v124_v49 = vmul.f32 %v102_v37, %v91_v31  ;;  %v132_v52 = vstv %s364_s22  ;;  %v433_v21 = vmov (!%p493_p5), 0.0  }
  0x3c   :  { %v100_v44 = vadd.f32 %v98_v36, %v96_v39  ;;  %v101_v45 = vadd.f32 %v99_v38, %v97_v40  ;;  %vm133_vm1 = vcmp.eq.s32.totalorder %v132_v52, 1  ;;  %314 = vst.msk [vmem:[%s664_s3] sm:$0xff] (!%p493_p5), %vm313_vm2, %v433_v21 }
  0x3e   :  { %v107_v50 = vmul.f32 %v106_v43, %v100_v44  ;;  %v108_v51 = vmul.f32 %v106_v43, %v101_v45 }
  0x40   :  { %v109_v53 = vadd.f32 %v107_v50, %v103_v41  ;;  %v110_v54 = vadd.f32 %v108_v51, %v104_v42  ;;  %v117_v55 = vadd.f32 %v115_v46, %v107_v50  ;;  %v118_v56 = vadd.f32 %v116_v47, %v108_v51 }
  0x41   :  { %v125_v57 = vadd.f32 %v123_v48, %v107_v50  ;;  %v126_v58 = vadd.f32 %v124_v49, %v108_v51  ;;  %141 = sbr.rel (%p493_p5) target bundleno = 162 (0xa2), region = 13 }
  0x42   :  { %v111_v59 = vmax.f32 %v109_v53, 0.0  ;;  %v112_v60 = vmax.f32 %v110_v54, 0.0  ;;  %v119_v61 = vmax.f32 %v117_v55, 0.0  ;;  %v120_v62 = vmax.f32 %v118_v56, 0.0 }
  0x43   :  { %v127_v63 = vmax.f32 %v125_v57, 0.0  ;;  %v128_v0 = vmax.f32 %v126_v58, 0.0 }
  0x44   :  { %v113_v1 = vmin.f32 %v111_v59, 1.0  ;;  %v114_v2 = vmin.f32 %v112_v60, 1.0  ;;  %v121_v3 = vmin.f32 %v119_v61, 1.0  ;;  %v122_v4 = vmin.f32 %v120_v62, 1.0 }
  0x45   :  { %v129_v5 = vmin.f32 %v127_v63, 1.0  ;;  %v130_v6 = vmin.f32 %v128_v0, 1.0 }
  0x46   :  { %v510_v7 = vsel %vm133_vm1, %v113_v1, %v86_v26  ;;  %v512_v8 = vsel %vm133_vm1, %v114_v2, %v87_v27  ;;  %v514_v9 = vsel %vm133_vm1, %v121_v3, %v88_v28  ;;  %v516_v10 = vsel %vm133_vm1, %v122_v4, %v89_v29 }
  0x47   :  { %v518_v11 = vsel %vm133_vm1, %v129_v5, %v90_v30  ;;  %v520_v12 = vsel %vm133_vm1, %v130_v6, %v91_v31  ;;  %v142_v13 = vmax.f32 (!%p493_p5), %v510_v7, %v514_v9  ;;  %v143_v14 = vmax.f32 (!%p493_p5), %v512_v8, %v516_v10 }
  0x48   :  { %v146_v15 = vmin.f32 %v510_v7, %v514_v9  ;;  %v147_v16 = vmin.f32 %v512_v8, %v516_v10  ;;  %v218_v5 = vstv %s484_s16 }
  0x49   :  { %v533_v17 = vmax.f32 %v142_v13, %v518_v11  ;;  %v536_v18 = vmax.f32 %v143_v14, %v520_v12 }
  0x4a   :  { %v148_v19 = vmin.f32 %v146_v15, %v518_v11  ;;  %v540_v20 = vmin.f32 %v147_v16, %v520_v12 }
  0x4b   :  { %v166_v26 = vsub.f32 %v533_v17, %v510_v7  ;;  %v170_v27 = vsub.f32 %v533_v17, %v514_v9  ;;  %v174_v28 = vsub.f32 %v533_v17, %v518_v11  ;;  %v167_v29 = vsub.f32 %v536_v18, %v512_v8 }
  0x4c   :  { %vm150_vm3 = vcmp.eq.f32.partialorder %v533_v17, %v148_v19  ;;  %vm151_vm4 = vcmp.eq.f32.partialorder %v536_v18, %v540_v20  ;;  %v551_v22 = vsub.f32 %v533_v17, %v148_v19  ;;  %v555_v23 = vsub.f32 %v536_v18, %v540_v20 }
  0x4d   :  { %v171_v30 = vsub.f32 %v536_v18, %v516_v10  ;;  %v175_v31 = vsub.f32 %v536_v18, %v520_v12  ;;  %vm184_vm5 = vcmp.eq.f32.partialorder %v533_v17, %v514_v9  ;;  %vm186_vm6 = vcmp.ne.f32.partialorder %v533_v17, %v510_v7 }
  0x4e   :  { %v160_v24 = vsel %vm150_vm3, 1.0, %v551_v22  ;;  %v161_v25 = vsel %vm151_vm4, 1.0, %v555_v23  ;;  %vm178_vm7 = vcmp.eq.f32.partialorder %v533_v17, %v510_v7  ;;  %vm185_vm8 = vcmp.eq.f32.partialorder %v536_v18, %v516_v10  ;;  %vm591_vm11 = vmand %vm184_vm5, %vm186_vm6 }
  0x4f   :  { %372 = vrcp.f32 %v160_v24  ;;  %vm187_vm9 = vcmp.ne.f32.partialorder %v536_v18, %v512_v8  ;;  %vm196_vm10 = vcmp.ne.f32.partialorder %v533_v17, %v514_v9  ;;  %vm197_vm12 = vcmp.ne.f32.partialorder %v536_v18, %v516_v10 }
  0x50   :  { %374 = vrcp.f32 %v161_v25  ;;  %vm179_vm13 = vcmp.eq.f32.partialorder %v536_v18, %v512_v8  ;;  %vm602_vm14 = vmand %vm185_vm8, %vm187_vm9  ;;  %v154_v0 = vsel %vm150_vm3, 1.0, %v533_v17  ;;  %v155_v13 = vsel %vm151_vm4, 1.0, %v536_v18 }
  0x51   :  { %vm198_vm15 = vmand %vm196_vm10, %vm186_vm6  ;;  %376 = vrcp.f32 %v154_v0  ;;  %vm324_vm8 = vcmask 122880  }
  0x52   :  { %vm199_vm0 = vmand %vm197_vm12, %vm187_vm9  ;;  %378 = vrcp.f32 %v155_v13 }
  0x59   :  { %v373_v32 = vpop.eup %372 }
  0x5a   :  { %v375_v33 = vpop.eup %374  ;;  %v168_v34 = vmul.f32 %v373_v32, %v166_v26  ;;  %v172_v35 = vmul.f32 %v373_v32, %v170_v27  ;;  %v176_v36 = vmul.f32 %v373_v32, %v174_v28 }
  0x5b   :  { %v169_v37 = vmul.f32 %v375_v33, %v167_v29  ;;  %v173_v38 = vmul.f32 %v375_v33, %v171_v30  ;;  %v177_v39 = vmul.f32 %v375_v33, %v175_v31  ;;  %v377_v28 = vpop.eup %376 }
  0x5c   :  { %v180_v41 = vsub.f32 %v176_v36, %v172_v35  ;;  %v190_v43 = vadd.f32 2.0, %v168_v34  ;;  %v200_v44 = vadd.f32 4.0, %v172_v35  ;;  %v157_v20 = vmul.f32 %v377_v28, %v551_v22 }
  0x5d   :  { %v181_v45 = vsub.f32 %v177_v39, %v173_v38  ;;  %v191_v46 = vadd.f32 2.0, %v169_v37  ;;  %v201_v47 = vadd.f32 4.0, %v173_v38  ;;  %v379_v38 = vpop.eup %378 }
  0x5e   :  { %v182_v48 = vsel %vm178_vm7, %v180_v41, 0.0  ;;  %v192_v49 = vsub.f32 %v190_v43, %v176_v36  ;;  %v202_v50 = vsub.f32 %v200_v44, %v168_v34 }
  0x5f   :  { %v183_v51 = vsel %vm179_vm13, %v181_v45, 0.0  ;;  %v193_v52 = vsub.f32 %v191_v46, %v177_v39  ;;  %v203_v53 = vsub.f32 %v201_v47, %v169_v37 }
  0x60   :  { %v194_v54 = vsel %vm591_vm11, %v192_v49, 0.0  ;;  %v204_v55 = vsel %vm198_vm15, %v202_v50, 0.0  ;;  %v159_v49 = vmul.f32 %v379_v38, %v555_v23 }
  0x61   :  { %v195_v56 = vsel %vm602_vm14, %v193_v52, 0.0  ;;  %v205_v57 = vsel %vm199_vm0, %v203_v53, 0.0  ;;  %v206_v58 = vadd.f32 %v194_v54, %v182_v48 }
  0x62   :  { %v207_v59 = vadd.f32 %v195_v56, %v183_v51 }
  0x63   :  { %v208_v60 = vadd.f32 %v206_v58, %v204_v55 }
  0x64   :  { %v209_v61 = vadd.f32 %v207_v59, %v205_v57 }
  0x65   :  { %v210_v62 = vmul.f32 0.16666667, %v208_v60  ;;  %v243_v60 = vmul.f32 %v157_v20, %v533_v17 }
  0x66   :  { %v211_v63 = vmul.f32 0.16666667, %v209_v61 }
  0x67   :  { %v212_v1 = vadd.f32 1.0, %v210_v62 }
  0x68   :  { %v213_v2 = vadd.f32 1.0, %v211_v63 }
  0x69   :  { %v214_v3 = vfloor.f32 %v212_v1 }
  0x6a   :  { %v215_v4 = vfloor.f32 %v213_v2 }
  0x6b   :  { %v216_v6 = vsub.f32 %v212_v1, %v214_v3 }
  0x6c   :  { %v217_v14 = vsub.f32 %v213_v2, %v215_v4 }
  0x6d   :  { %v219_v15 = vadd.f32 %v218_v5, %v216_v6 }
  0x6e   :  { %v220_v16 = vadd.f32 %v218_v5, %v217_v14 }
  0x6f   :  { %v221_v24 = vfloor.f32 %v219_v15 }
  0x70   :  { %v222_v25 = vfloor.f32 %v220_v16 }
  0x71   :  { %v223_v19 = vsub.f32 %v219_v15, %v221_v24 }
  0x72   :  { %v224_v26 = vsub.f32 %v220_v16, %v222_v25 }
  0x73   :  { %v225_v27 = vmul.f32 6.0, %v223_v19 }
  0x74   :  { %v226_v29 = vmul.f32 6.0, %v224_v26 }
  0x75   :  { %v227_v30 = vadd.f32 5.0, %v225_v27  ;;  %v253_v31 = vadd.f32 3.0, %v225_v27  ;;  %v277_v32 = vadd.f32 1.0, %v225_v27 }
  0x76   :  { %v228_v33 = vadd.f32 5.0, %v226_v29  ;;  %v254_v34 = vadd.f32 3.0, %v226_v29  ;;  %v278_v35 = vadd.f32 1.0, %v226_v29 }
  0x77   :  { %vm229_vm1 = vcmp.ge.f32.partialorder %v227_v30, 6.0  ;;  %vm255_vm3 = vcmp.ge.f32.partialorder %v253_v31, 6.0  ;;  %vm279_vm4 = vcmp.ge.f32.partialorder %v277_v32, 6.0 }
  0x78   :  { %vm230_vm5 = vcmp.ge.f32.partialorder %v228_v33, 6.0  ;;  %v231_v36 = vsel %vm229_vm1, 6.0, %v433_v21  ;;  %vm256_vm6 = vcmp.ge.f32.partialorder %v254_v34, 6.0  ;;  %v257_v37 = vsel %vm255_vm3, 6.0, %v433_v21 }
  0x79   :  { %v232_v39 = vsel %vm230_vm5, 6.0, %v433_v21  ;;  %v233_v40 = vsub.f32 %v227_v30, %v231_v36  ;;  %v258_v41 = vsel %vm256_vm6, 6.0, %v433_v21  ;;  %v259_v42 = vsub.f32 %v253_v31, %v257_v37 }
  0x7a   :  { %v234_v43 = vsub.f32 %v228_v33, %v232_v39  ;;  %v260_v44 = vsub.f32 %v254_v34, %v258_v41  ;;  %vm280_vm7 = vcmp.ge.f32.partialorder %v278_v35, 6.0  ;;  %v281_v22 = vsel %vm279_vm4, 6.0, %v433_v21 }
  0x7b   :  { %v235_v45 = vsub.f32 4.0, %v233_v40  ;;  %v261_v46 = vsub.f32 4.0, %v259_v42  ;;  %v282_v47 = vsel %vm280_vm7, 6.0, %v433_v21  ;;  %v283_v48 = vsub.f32 %v277_v32, %v281_v22 }
  0x7c   :  { %v236_v50 = vsub.f32 4.0, %v234_v43  ;;  %v262_v51 = vsub.f32 4.0, %v260_v44  ;;  %v284_v52 = vsub.f32 %v278_v35, %v282_v47  ;;  %v244_v21 = vmul.f32 %v159_v49, %v536_v18 }
  0x7d   :  { %v237_v53 = vmin.f32 %v233_v40, %v235_v45  ;;  %v263_v54 = vmin.f32 %v259_v42, %v261_v46  ;;  %v285_v55 = vsub.f32 4.0, %v283_v48 }
  0x7e   :  { %v238_v56 = vmin.f32 %v234_v43, %v236_v50  ;;  %v264_v57 = vmin.f32 %v260_v44, %v262_v51  ;;  %v286_v58 = vsub.f32 4.0, %v284_v52 }
  0x7f   :  { %v239_v59 = vmax.f32 %v237_v53, 0.0  ;;  %v265_v61 = vmax.f32 %v263_v54, 0.0  ;;  %v287_v62 = vmin.f32 %v283_v48, %v285_v55 }
  0x80   :  { %v240_v63 = vmax.f32 %v238_v56, 0.0  ;;  %v266_v0 = vmax.f32 %v264_v57, 0.0  ;;  %v288_v1 = vmin.f32 %v284_v52, %v286_v58 }
  0x81   :  { %v241_v23 = vmin.f32 %v239_v59, 1.0  ;;  %v267_v2 = vmin.f32 %v265_v61, 1.0  ;;  %v289_v3 = vmax.f32 %v287_v62, 0.0 }
  0x82   :  { %v242_v4 = vmin.f32 %v240_v63, 1.0  ;;  %v268_v5 = vmin.f32 %v266_v0, 1.0  ;;  %v290_v6 = vmax.f32 %v288_v1, 0.0 }
  0x83   :  { %v245_v13 = vmul.f32 %v243_v60, %v241_v23  ;;  %v269_v14 = vmul.f32 %v267_v2, %v243_v60  ;;  %v291_v15 = vmin.f32 %v289_v3, 1.0 }
  0x84   :  { %v246_v16 = vmul.f32 %v244_v21, %v242_v4  ;;  %v270_v24 = vmul.f32 %v268_v5, %v244_v21  ;;  %v292_v25 = vmin.f32 %v290_v6, 1.0 }
  0x85   :  { %v247_v19 = vsub.f32 %v533_v17, %v245_v13  ;;  %v271_v26 = vsub.f32 %v533_v17, %v269_v14  ;;  %v293_v27 = vmul.f32 %v291_v15, %v243_v60 }
  0x86   :  { %v248_v28 = vsub.f32 %v536_v18, %v246_v16  ;;  %v272_v29 = vsub.f32 %v536_v18, %v270_v24  ;;  %v294_v30 = vmul.f32 %v292_v25, %v244_v21 }
  0x87   :  { %v249_v31 = vmax.f32 %v247_v19, 0.0  ;;  %v273_v32 = vmax.f32 %v271_v26, 0.0  ;;  %v295_v33 = vsub.f32 %v533_v17, %v293_v27 }
  0x88   :  { %v250_v34 = vmax.f32 %v248_v28, 0.0  ;;  %v274_v35 = vmax.f32 %v272_v29, 0.0  ;;  %v296_v20 = vsub.f32 %v536_v18, %v294_v30 }
  0x89   :  { %v251_v36 = vmin.f32 %v249_v31, 1.0  ;;  %v275_v37 = vmin.f32 %v273_v32, 1.0  ;;  %v297_v38 = vmax.f32 %v295_v33, 0.0 }
  0x8a   :  { %v252_v39 = vmin.f32 %v250_v34, 1.0  ;;  %v276_v40 = vmin.f32 %v274_v35, 1.0  ;;  %v298_v41 = vmax.f32 %v296_v20, 0.0 }
  0x8b   :  { %v299_v42 = vmin.f32 %v297_v38, 1.0  ;;  %v301_v43 = vmul.f32 0.2989, %v251_v36  ;;  %v303_v44 = vmul.f32 0.587, %v275_v37 }
  0x8c   :  { %v300_v22 = vmin.f32 %v298_v41, 1.0  ;;  %v302_v45 = vmul.f32 0.2989, %v252_v39  ;;  %v304_v46 = vmul.f32 0.587, %v276_v40 }
  0x8d   :  { %v305_v47 = vadd.f32 %v303_v44, %v301_v43  ;;  %v307_v48 = vmul.f32 0.114, %v299_v42 }
  0x8e   :  { %v306_v49 = vadd.f32 %v304_v46, %v302_v45  ;;  %v308_v17 = vmul.f32 0.114, %v300_v22 }
  0x8f   :  { %v309_v50 = vadd.f32 %v307_v48, %v305_v47 }
  0x90   :  { %v310_v51 = vadd.f32 %v308_v17, %v306_v49 }
  0x91   :  { %v315_v18 = vsel %vm313_vm2, %v309_v50, 0.0 }
  0x92   :  { %v316_v52 = vsel %vm313_vm2, %v310_v51, 0.0 }
  0x93   :  { %v317_v53 = vadd.f32 %v316_v52, %v315_v18 }
  0x95   :  { %v318_v54 = vrot.slane %v317_v53, 4 }
  0x97   :  { %v319_v55 = vadd.f32 %v318_v54, %v317_v53 }
  0x99   :  { %v320_v56 = vrot.slane %v319_v55, 2 }
  0x9b   :  { %v321_v57 = vadd.f32 %v320_v56, %v319_v55 }
  0x9d   :  { %v322_v58 = vrot.slane %v321_v57, 1 }
  0x9f   :  { %v323_v59 = vadd.f32 %v322_v58, %v321_v57 }
  0xa1   :  { %325 = vst.msk [vmem:[%s664_s3] sm:$0x1] %vm324_vm8, %v323_v59 }
  0xa2 PF:  { %328 = sbr.rel (!%p493_p5) target bundleno = 185 (0xb9), region = 17  ;;  %v329_v60 = vmul.f32 (%p493_p5), 0.2989, %v510_v7  ;;  %v330_v61 = vmul.f32 (%p493_p5), 0.2989, %v512_v8  ;;  %vm341_vm2 = vcmask (%p493_p5), 130048  }
  0xa3   :  { %v331_v62 = vmul.f32 (%p493_p5), 0.587, %v514_v9  ;;  %v332_v63 = vmul.f32 (%p493_p5), 0.587, %v516_v10  ;;  %v335_v21 = vmul.f32 (%p493_p5), 0.114, %v518_v11 }
  0xa4   :  { %v336_v0 = vmul.f32 (%p493_p5), 0.114, %v520_v12  ;;  %v434_v2 = vmov (%p493_p5), 0.0   ;;  %vm352_vm9 = vcmask (%p493_p5), 122880  }
  0xa5   :  { %v333_v1 = vadd.f32 (%p493_p5), %v331_v62, %v329_v60  ;;  %v334_v23 = vadd.f32 (%p493_p5), %v332_v63, %v330_v61  ;;  %342 = vst.msk [vmem:[%s664_s3] sm:$0xff] (%p493_p5), %vm341_vm2, %v434_v2 }
  0xa7   :  { %v337_v3 = vadd.f32 (%p493_p5), %v335_v21, %v333_v1  ;;  %v338_v7 = vadd.f32 (%p493_p5), %v336_v0, %v334_v23 }
  0xa9   :  { %v343_v4 = vsel %vm341_vm2, %v337_v3, 0.0  ;;  %v344_v8 = vsel %vm341_vm2, %v338_v7, 0.0 }
  0xaa   :  { %v345_v5 = vadd.f32 %v344_v8, %v343_v4 }
  0xac   :  { %v346_v9 = vrot.slane %v345_v5, 4 }
  0xae   :  { %v347_v6 = vadd.f32 %v346_v9, %v345_v5 }
  0xb0   :  { %v348_v10 = vrot.slane %v347_v6, 2 }
  0xb2   :  { %v349_v13 = vadd.f32 %v348_v10, %v347_v6 }
  0xb4   :  { %v350_v11 = vrot.slane %v349_v13, 1 }
  0xb6   :  { %v351_v12 = vadd.f32 %v350_v11, %v349_v13 }
  0xb8   :  { %353 = vst.msk [vmem:[%s664_s3] sm:$0x1] %vm352_vm9, %v351_v12 }
  0xb9 PF:  { %358 = vsyncpa [#allocation6], 1 }

// kernel: _color_jitter_with_mean_call.3
= control target key start
LH: loop header
LB: loop body
LE: loop exit
PB: predicated region body
PF: predicated region fallthrough
CT: control target
= control target key end

     0   :  { %s820_s0 = inlined_call_operand.vmem [shape: s32[8], index: 0, kind: input, shape index: {}]   ;;  %s821_s2 = inlined_call_operand.vmem [shape: f32[3,16,16], index: 2, kind: input, shape index: {}]   ;;  %s822_s3 = inlined_call_operand.hbm [shape: f32[3,16,16], index: 3, kind: output, shape index: {}]   ;;  %s823_s1 = inlined_call_operand.vmem [shape: f32[8], index: 1, kind: input, shape index: {}]  }
   0x1   :  { %s8_s14 = sshll.u32 %s820_s0, 4  ;;  %s12_s17 = sshll.u32 %s823_s1, 4  ;;  %s9_s14 = int_to_ptr.vmem [resolvable:$true] %s8_s14  ;;  %s13_s17 = int_to_ptr.vmem [resolvable:$true] %s12_s17 }
   0x2   :  { %s451_s18 = scalar_lea.vmem %s9_s14, 16  ;;  %p456_p1 = scmp.lt.s32.totalorder %s9_s14, %s9_s14 }
   0x3   :  { %p452_p0 = scmp.ne.s32.totalorder %s9_s14, %s451_s18  ;;  %p457_p2 = scmp.lt.s32.totalorder %s451_s18, %s451_s18 }
   0x5   :  { %p458_p3 = por %p457_p2, %p456_p1 }
   0x7   :  { %p459_p4 = pnand %p458_p3, %p452_p0 }
   0x9   :  { %462 = shalt.err (!%p459_p4)  }
   0xa   :  { %s501_s19 = smov [#allocation3]   ;;  %s463_s20 = scalar_lea.vmem %s13_s17, 16 }
   0xb   :  { %11 = dma.vmem_to_smem %s9_s14, 16, %s501_s19, [#allocation2] }
   0xc   :  { %p464_p5 = scmp.ne.s32.totalorder %s13_s17, %s463_s20  ;;  %p468_p6 = scmp.lt.s32.totalorder %s13_s17, %s13_s17 }
   0xd   :  { %p469_p7 = scmp.lt.s32.totalorder %s463_s20, %s463_s20 }
   0xf   :  { %p470_p8 = por %p469_p7, %p468_p6 }
  0x11   :  { %p471_p9 = pnand %p470_p8, %p464_p5 }
  0x13   :  { %474 = shalt.err (!%p471_p9)  }
  0x14   :  { %s502_s0 = smov [#allocation4]  }
  0x15   :  { %15 = dma.vmem_to_smem %s13_s17, 16, %s502_s0, [#allocation2] }
  0x16   :  { %497 = dma.done.wait [#allocation2], 32 }
  0x17   :  { %498 = vsyncadd [#allocation2], 4294967264 }
  0x18   :  { %17 = sfence }
  0x19   :  { %18 = vsyncpa [#allocation6], 0  ;;  %s21_s1 = sld [smem:[#allocation3]]  ;;  %s533_s21 = sld [smem:[#allocation3 + $0x1]]  ;;  %v36_v0 = vld [vmem:[%s821_s2] sm:$0xff]  ;;  %v37_v1 = vld [vmem:[%s821_s2 + $0x8] sm:$0xff] }
  0x1a   :  { %s535_s22 = sld [smem:[#allocation3 + $0x3]]  ;;  %s537_s23 = sld [smem:[#allocation3 + $0x4]]  ;;  %v431_v2 = vld [vmem:[%s821_s2 + $0x10] sm:$0xff]  ;;  %v432_v3 = vld [vmem:[%s821_s2 + $0x18] sm:$0xff]  ;;  %v433_v4 = vld [vmem:[%s821_s2 + $0x20] sm:$0xff] }
  0x1b   :  { %s31_s24 = sld [smem:[#allocation4]]  ;;  %s539_s25 = sld [smem:[#allocation4 + $0x1]]  ;;  %v434_v5 = vld [vmem:[%s821_s2 + $0x28] sm:$0xff] }
  0x1c   :  { %s541_s26 = sld [smem:[#allocation4 + $0x3]]  ;;  %s430_s27 = sld [smem:[#allocation4 + $0x4]] }
  0x1d   :  { %s573_s16 = sld [smem:[#allocation3 + $0x2]] }
  0x1e   :  { %s575_s17 = sld [smem:[#allocation4 + $0x2]] }
  0x1f   :  { %p22_p10 = scmp.gt.s32.totalorder %s21_s1, 0  ;;  %p24_p12 = scmp.gt.s32.totalorder %s533_s21, 0 }
  0x20   :  { %p30_p11 = scmp.gt.s32.totalorder %s537_s23, 0  ;;  %p435_p0 = scmp.le.s32.totalorder %s535_s22, 0 }
  0x21   :  { %v44_v6 = vstv %s31_s24  ;;  %s63_s13 = scalar_select %p22_p10, 1, 0  ;;  %v565_v20 = vstv %s539_s25 }
  0x22   :  { %v45_v7 = vmul.f32 %v44_v6, %v36_v0  ;;  %v46_v8 = vmul.f32 %v44_v6, %v37_v1  ;;  %v51_v9 = vmul.f32 %v431_v2, %v44_v6  ;;  %v52_v10 = vmul.f32 %v432_v3, %v44_v6  ;;  %s75_s14 = ssub.f32 1.0, %s539_s25 }
  0x23   :  { %v57_v11 = vmul.f32 %v433_v4, %v44_v6  ;;  %v58_v12 = vmul.f32 %v434_v5, %v44_v6  ;;  %v64_v19 = vstv %s63_s13  ;;  %s100_s15 = scalar_select %p24_p12, 1, 0 }
  0x24   :  { %v47_v13 = vmax.f32 %v45_v7, 0.0  ;;  %v48_v14 = vmax.f32 %v46_v8, 0.0  ;;  %v53_v15 = vmax.f32 %v51_v9, 0.0  ;;  %v54_v16 = vmax.f32 %v52_v10, 0.0  ;;  %s76_s2 = smul.f32 %s430_s27, %s75_s14  ;;  %p26_p13 = scmp.gt.s32.totalorder %s573_s16, 0 }
  0x25   :  { %v59_v17 = vmax.f32 %v57_v11, 0.0  ;;  %v60_v18 = vmax.f32 %v58_v12, 0.0  ;;  %vm65_vm0 = vcmp.eq.s32.totalorder %v64_v19, 1  ;;  %v101_v42 = vstv %s100_s15  ;;  %s122_s18 = ssub.f32 1.0, %s575_s17 }
  0x26   :  { %v49_v21 = vmin.f32 %v47_v13, 1.0  ;;  %v50_v22 = vmin.f32 %v48_v14, 1.0  ;;  %v55_v23 = vmin.f32 %v53_v15, 1.0  ;;  %v56_v24 = vmin.f32 %v54_v16, 1.0  ;;  %s148_s19 = scalar_select %p26_p13, 1, 0 }
  0x27   :  { %v61_v25 = vmin.f32 %v59_v17, 1.0  ;;  %v62_v26 = vmin.f32 %v60_v18, 1.0  ;;  %v567_v27 = vstv %s76_s2  ;;  %vm587_vm1 = vcmp.eq.s32.totalorder %v101_v42, 1 }
  0x28   :  { %v66_v28 = vsel %vm65_vm0, %v49_v21, %v36_v0  ;;  %v67_v29 = vsel %vm65_vm0, %v50_v22, %v37_v1  ;;  %v68_v30 = vsel %vm65_vm0, %v55_v23, %v431_v2  ;;  %v69_v31 = vsel %vm65_vm0, %v56_v24, %v432_v3 }
  0x29   :  { %v70_v32 = vsel %vm65_vm0, %v61_v25, %v433_v4  ;;  %v71_v33 = vsel %vm65_vm0, %v62_v26, %v434_v5  ;;  %v73_v34 = vmul.f32 %v565_v20, %v66_v28  ;;  %v74_v35 = vmul.f32 %v565_v20, %v67_v29 }
  0x2a   :  { %v84_v36 = vmul.f32 %v565_v20, %v68_v30  ;;  %v85_v37 = vmul.f32 %v565_v20, %v69_v31  ;;  %v92_v38 = vmul.f32 %v565_v20, %v70_v32  ;;  %v93_v39 = vmul.f32 %v565_v20, %v71_v33 }
  0x2b   :  { %v78_v40 = vadd.f32 %v567_v27, %v73_v34  ;;  %v79_v41 = vadd.f32 %v567_v27, %v74_v35  ;;  %v119_v8 = vstv %s575_s17  ;;  %v123_v11 = vstv %s122_s18 }
  0x2c   :  { %v86_v43 = vadd.f32 %v84_v36, %v567_v27  ;;  %v87_v44 = vadd.f32 %v85_v37, %v567_v27  ;;  %v94_v45 = vadd.f32 %v92_v38, %v567_v27  ;;  %v95_v46 = vadd.f32 %v93_v39, %v567_v27 }
  0x2d   :  { %v80_v47 = vmax.f32 %v78_v40, 0.0  ;;  %v81_v48 = vmax.f32 %v79_v41, 0.0  ;;  %v149_v26 = vstv %s148_s19 }
  0x2e   :  { %v88_v50 = vmax.f32 %v86_v43, 0.0  ;;  %v89_v51 = vmax.f32 %v87_v44, 0.0  ;;  %v96_v52 = vmax.f32 %v94_v45, 0.0  ;;  %v97_v53 = vmax.f32 %v95_v46, 0.0 }
  0x2f   :  { %v82_v54 = vmin.f32 %v80_v47, 1.0  ;;  %v83_v55 = vmin.f32 %v81_v48, 1.0  ;;  %vm150_vm2 = vcmp.eq.s32.totalorder %v149_v26, 1 }
  0x30   :  { %v90_v56 = vmin.f32 %v88_v50, 1.0  ;;  %v91_v57 = vmin.f32 %v89_v51, 1.0  ;;  %v98_v58 = vmin.f32 %v96_v52, 1.0  ;;  %v99_v59 = vmin.f32 %v97_v53, 1.0 }
  0x31   :  { %v103_v60 = vsel %vm587_vm1, %v82_v54, %v66_v28  ;;  %v104_v61 = vsel %vm587_vm1, %v83_v55, %v67_v29 }
  0x32   :  { %v105_v62 = vsel %vm587_vm1, %v90_v56, %v68_v30  ;;  %v106_v63 = vsel %vm587_vm1, %v91_v57, %v69_v31  ;;  %v107_v0 = vsel %vm587_vm1, %v98_v58, %v70_v32  ;;  %v108_v1 = vsel %vm587_vm1, %v99_v59, %v71_v33 }
  0x33   :  { %v109_v2 = vmul.f32 0.2989, %v103_v60  ;;  %v110_v3 = vmul.f32 0.2989, %v104_v61  ;;  %v111_v4 = vmul.f32 0.587, %v105_v62  ;;  %v120_v13 = vmul.f32 %v119_v8, %v103_v60 }
  0x34   :  { %v112_v5 = vmul.f32 0.587, %v106_v63  ;;  %v115_v6 = vmul.f32 0.114, %v107_v0  ;;  %v116_v7 = vmul.f32 0.114, %v108_v1  ;;  %v132_v14 = vmul.f32 %v119_v8, %v105_v62 }
  0x35   :  { %v113_v9 = vadd.f32 %v111_v4, %v109_v2  ;;  %v140_v15 = vmul.f32 %v119_v8, %v107_v0  ;;  %v121_v17 = vmul.f32 %v119_v8, %v104_v61  ;;  %v133_v18 = vmul.f32 %v119_v8, %v106_v63 }
  0x36   :  { %v114_v10 = vadd.f32 %v112_v5, %v110_v3  ;;  %v141_v19 = vmul.f32 %v119_v8, %v108_v1 }
  0x37   :  { %v117_v12 = vadd.f32 %v115_v6, %v113_v9 }
  0x38   :  { %v118_v16 = vadd.f32 %v116_v7, %v114_v10 }
  0x39   :  { %v124_v21 = vmul.f32 %v123_v11, %v117_v12 }
  0x3a   :  { %v125_v22 = vmul.f32 %v123_v11, %v118_v16 }
  0x3b   :  { %v126_v23 = vadd.f32 %v124_v21, %v120_v13  ;;  %v134_v24 = vadd.f32 %v132_v14, %v124_v21  ;;  %v142_v25 = vadd.f32 %v140_v15, %v124_v21 }
  0x3c   :  { %v127_v28 = vadd.f32 %v125_v22, %v121_v17  ;;  %v135_v29 = vadd.f32 %v133_v18, %v125_v22  ;;  %v143_v30 = vadd.f32 %v141_v19, %v125_v22  ;;  %159 = sbr.rel (%p435_p0) target bundleno = 149 (0x95), region = 9 }
  0x3d   :  { %v128_v31 = vmax.f32 %v126_v23, 0.0  ;;  %v136_v32 = vmax.f32 %v134_v24, 0.0  ;;  %v144_v33 = vmax.f32 %v142_v25, 0.0 }
  0x3e   :  { %v129_v34 = vmax.f32 %v127_v28, 0.0  ;;  %v137_v35 = vmax.f32 %v135_v29, 0.0  ;;  %v145_v36 = vmax.f32 %v143_v30, 0.0 }
  0x3f   :  { %v130_v37 = vmin.f32 %v128_v31, 1.0  ;;  %v138_v38 = vmin.f32 %v136_v32, 1.0  ;;  %v146_v39 = vmin.f32 %v144_v33, 1.0 }
  0x40   :  { %v131_v40 = vmin.f32 %v129_v34, 1.0  ;;  %v139_v41 = vmin.f32 %v137_v35, 1.0  ;;  %v147_v42 = vmin.f32 %v145_v36, 1.0 }
  0x41   :  { %v608_v43 = vsel %vm150_vm2, %v130_v37, %v103_v60  ;;  %v610_v44 = vsel %vm150_vm2, %v138_v38, %v105_v62  ;;  %v612_v45 = vsel %vm150_vm2, %v146_v39, %v107_v0  ;;  %v236_v39 = vstv (!%p435_p0), %s541_s26 }
  0x42   :  { %v614_v46 = vsel %vm150_vm2, %v131_v40, %v104_v61  ;;  %v616_v47 = vsel %vm150_vm2, %v139_v41, %v106_v63  ;;  %v618_v48 = vsel %vm150_vm2, %v147_v42, %v108_v1  ;;  %v160_v49 = vmax.f32 (!%p435_p0), %v608_v43, %v610_v44 }
  0x43   :  { %v164_v50 = vmin.f32 %v608_v43, %v610_v44  ;;  %v161_v51 = vmax.f32 %v614_v46, %v616_v47  ;;  %v165_v52 = vmin.f32 %v614_v46, %v616_v47  ;;  %s343_s20 = scalar_select %p30_p11, 1, 0 }
  0x44   :  { %v630_v53 = vmax.f32 %v160_v49, %v612_v45 }
  0x45   :  { %v166_v54 = vmin.f32 %v164_v50, %v612_v45  ;;  %v634_v55 = vmax.f32 %v161_v51, %v618_v48  ;;  %v637_v56 = vmin.f32 %v165_v52, %v618_v48 }
  0x46   :  { %v184_v61 = vsub.f32 %v630_v53, %v608_v43  ;;  %v188_v62 = vsub.f32 %v630_v53, %v610_v44  ;;  %v192_v63 = vsub.f32 %v630_v53, %v612_v45  ;;  %vm202_vm5 = vcmp.eq.f32.partialorder %v630_v53, %v610_v44 }
  0x47   :  { %vm168_vm3 = vcmp.eq.f32.partialorder %v630_v53, %v166_v54  ;;  %v641_v57 = vsub.f32 %v630_v53, %v166_v54  ;;  %vm169_vm4 = vcmp.eq.f32.partialorder %v634_v55, %v637_v56  ;;  %v650_v59 = vsub.f32 %v634_v55, %v637_v56 }
  0x48   :  { %vm204_vm6 = vcmp.ne.f32.partialorder %v630_v53, %v608_v43  ;;  %v185_v1 = vsub.f32 %v634_v55, %v614_v46  ;;  %v189_v2 = vsub.f32 %v634_v55, %v616_v47  ;;  %v193_v3 = vsub.f32 %v634_v55, %v618_v48 }
  0x49   :  { %v178_v58 = vsel %vm168_vm3, 1.0, %v641_v57  ;;  %v179_v60 = vsel %vm169_vm4, 1.0, %v650_v59  ;;  %vm214_vm7 = vcmp.ne.f32.partialorder %v630_v53, %v610_v44  ;;  %vm196_vm8 = vcmp.eq.f32.partialorder %v630_v53, %v608_v43  ;;  %vm681_vm10 = vmand %vm202_vm5, %vm204_vm6 }
  0x4a   :  { %443 = vrcp.f32 %v178_v58  ;;  %vm203_vm9 = vcmp.eq.f32.partialorder %v634_v55, %v616_v47  ;;  %vm205_vm11 = vcmp.ne.f32.partialorder %v634_v55, %v614_v46  ;;  %vm216_vm12 = vmand %vm214_vm7, %vm204_vm6  ;;  %vm215_vm13 = vcmp.ne.f32.partialorder %v634_v55, %v616_v47 }
  0x4b   :  { %445 = vrcp.f32 %v179_v60  ;;  %vm197_vm14 = vcmp.eq.f32.partialorder %v634_v55, %v614_v46  ;;  %vm207_vm15 = vmand %vm203_vm9, %vm205_vm11  ;;  %v172_v38 = vsel %vm168_vm3, 1.0, %v630_v53  ;;  %v173_v50 = vsel %vm169_vm4, 1.0, %v634_v55 }
  0x4c   :  { %vm217_vm0 = vmand %vm215_vm13, %vm205_vm11  ;;  %447 = vrcp.f32 %v172_v38 }
  0x4d   :  { %449 = vrcp.f32 %v173_v50 }
  0x54   :  { %v444_v0 = vpop.eup %443 }
  0x55   :  { %v186_v4 = vmul.f32 %v444_v0, %v184_v61  ;;  %v190_v5 = vmul.f32 %v444_v0, %v188_v62  ;;  %v194_v6 = vmul.f32 %v444_v0, %v192_v63  ;;  %v446_v7 = vpop.eup %445 }
  0x56   :  { %v187_v12 = vmul.f32 %v446_v7, %v185_v1  ;;  %v191_v13 = vmul.f32 %v446_v7, %v189_v2  ;;  %v195_v14 = vmul.f32 %v446_v7, %v193_v3  ;;  %v448_v3 = vpop.eup %447 }
  0x57   :  { %v198_v8 = vsub.f32 %v194_v6, %v190_v5  ;;  %v208_v10 = vadd.f32 2.0, %v186_v4  ;;  %v218_v11 = vadd.f32 4.0, %v190_v5 }
  0x58   :  { %v199_v18 = vsub.f32 %v195_v14, %v191_v13  ;;  %v209_v19 = vadd.f32 2.0, %v187_v12  ;;  %v219_v21 = vadd.f32 4.0, %v191_v13  ;;  %v175_v13 = vmul.f32 %v448_v3, %v641_v57 }
  0x59   :  { %v200_v15 = vsel %vm196_vm8, %v198_v8, 0.0  ;;  %v210_v16 = vsub.f32 %v208_v10, %v194_v6  ;;  %v220_v17 = vsub.f32 %v218_v11, %v186_v4  ;;  %v503_v4 = vmov 0.0  }
  0x5a   :  { %v201_v25 = vsel %vm197_vm14, %v199_v18, 0.0  ;;  %v211_v26 = vsub.f32 %v209_v19, %v195_v14  ;;  %v221_v28 = vsub.f32 %v219_v21, %v187_v12  ;;  %v450_v12 = vpop.eup %449  ;;  %vm352_vm8 = vcmask 130048  }
  0x5b   :  { %v212_v22 = vsel %vm681_vm10, %v210_v16, 0.0  ;;  %v222_v23 = vsel %vm216_vm12, %v220_v17, 0.0 }
  0x5c   :  { %v224_v24 = vadd.f32 %v212_v22, %v200_v15  ;;  %v213_v30 = vsel %vm207_vm15, %v211_v26, 0.0  ;;  %v223_v31 = vsel %vm217_vm0, %v221_v28, 0.0 }
  0x5d   :  { %v225_v32 = vadd.f32 %v213_v30, %v201_v25 }
  0x5e   :  { %v226_v29 = vadd.f32 %v224_v24, %v222_v23  ;;  %v177_v24 = vmul.f32 %v450_v12, %v650_v59 }
  0x5f   :  { %v227_v34 = vadd.f32 %v225_v32, %v223_v31  ;;  %v261_v32 = vmul.f32 %v175_v13, %v630_v53 }
  0x60   :  { %v228_v33 = vmul.f32 0.16666667, %v226_v29 }
  0x61   :  { %v229_v36 = vmul.f32 0.16666667, %v227_v34 }
  0x62   :  { %v230_v35 = vadd.f32 1.0, %v228_v33 }
  0x63   :  { %v231_v40 = vadd.f32 1.0, %v229_v36 }
  0x64   :  { %v232_v37 = vfloor.f32 %v230_v35 }
  0x65   :  { %v233_v42 = vfloor.f32 %v231_v40 }
  0x66   :  { %v234_v41 = vsub.f32 %v230_v35, %v232_v37 }
  0x67   :  { %v235_v51 = vsub.f32 %v231_v40, %v233_v42 }
  0x68   :  { %v237_v49 = vadd.f32 %v236_v39, %v234_v41 }
  0x69   :  { %v238_v58 = vadd.f32 %v236_v39, %v235_v51  ;;  %v262_v39 = vmul.f32 %v177_v24, %v634_v55 }
  0x6a   :  { %v239_v52 = vfloor.f32 %v237_v49 }
  0x6b   :  { %v240_v61 = vfloor.f32 %v238_v58 }
  0x6c   :  { %v241_v60 = vsub.f32 %v237_v49, %v239_v52 }
  0x6d   :  { %v242_v54 = vsub.f32 %v238_v58, %v240_v61 }
  0x6e   :  { %v243_v62 = vmul.f32 6.0, %v241_v60 }
  0x6f   :  { %v244_v2 = vmul.f32 6.0, %v242_v54 }
  0x70   :  { %v245_v63 = vadd.f32 5.0, %v243_v62  ;;  %v271_v0 = vadd.f32 3.0, %v243_v62  ;;  %v295_v1 = vadd.f32 1.0, %v243_v62 }
  0x71   :  { %v246_v56 = vadd.f32 5.0, %v244_v2  ;;  %v272_v7 = vadd.f32 3.0, %v244_v2  ;;  %v296_v11 = vadd.f32 1.0, %v244_v2 }
  0x72   :  { %vm247_vm1 = vcmp.ge.f32.partialorder %v245_v63, 6.0  ;;  %vm273_vm2 = vcmp.ge.f32.partialorder %v271_v0, 6.0  ;;  %vm297_vm3 = vcmp.ge.f32.partialorder %v295_v1, 6.0 }
  0x73   :  { %v249_v5 = vsel %vm247_vm1, 6.0, %v503_v4  ;;  %v275_v6 = vsel %vm273_vm2, 6.0, %v503_v4  ;;  %v299_v10 = vsel %vm297_vm3, 6.0, %v503_v4  ;;  %vm248_vm4 = vcmp.ge.f32.partialorder %v246_v56, 6.0 }
  0x74   :  { %v251_v8 = vsub.f32 %v245_v63, %v249_v5  ;;  %v277_v9 = vsub.f32 %v271_v0, %v275_v6  ;;  %vm274_vm5 = vcmp.ge.f32.partialorder %v272_v7, 6.0  ;;  %v301_v14 = vsub.f32 %v295_v1, %v299_v10 }
  0x75   :  { %v250_v16 = vsel %vm248_vm4, 6.0, %v503_v4  ;;  %v276_v18 = vsel %vm274_vm5, 6.0, %v503_v4  ;;  %vm298_vm6 = vcmp.ge.f32.partialorder %v296_v11, 6.0 }
  0x76   :  { %v253_v15 = vsub.f32 4.0, %v251_v8  ;;  %v279_v17 = vsub.f32 4.0, %v277_v9  ;;  %v252_v19 = vsub.f32 %v246_v56, %v250_v16  ;;  %v278_v21 = vsub.f32 %v272_v7, %v276_v18 }
  0x77   :  { %v303_v22 = vsub.f32 4.0, %v301_v14  ;;  %v300_v26 = vsel %vm298_vm6, 6.0, %v503_v4 }
  0x78   :  { %v255_v23 = vmin.f32 %v251_v8, %v253_v15  ;;  %v281_v25 = vmin.f32 %v277_v9, %v279_v17  ;;  %v254_v28 = vsub.f32 4.0, %v252_v19  ;;  %v280_v29 = vsub.f32 4.0, %v278_v21 }
  0x79   :  { %v305_v30 = vmin.f32 %v301_v14, %v303_v22  ;;  %v302_v57 = vsub.f32 %v296_v11, %v300_v26  ;;  %v344_v14 = vstv %s343_s20 }
  0x7a   :  { %v257_v31 = vmax.f32 %v255_v23, 0.0  ;;  %v283_v33 = vmax.f32 %v281_v25, 0.0  ;;  %v256_v34 = vmin.f32 %v252_v19, %v254_v28  ;;  %v282_v35 = vmin.f32 %v278_v21, %v280_v29 }
  0x7b   :  { %v307_v36 = vmax.f32 %v305_v30, 0.0  ;;  %v304_v37 = vsub.f32 4.0, %v302_v57  ;;  %vm733_vm7 = vcmp.eq.s32.totalorder %v344_v14, 1 }
  0x7c   :  { %v259_v38 = vmin.f32 %v257_v31, 1.0  ;;  %v285_v40 = vmin.f32 %v283_v33, 1.0  ;;  %v258_v41 = vmax.f32 %v256_v34, 0.0  ;;  %v284_v59 = vmax.f32 %v282_v35, 0.0 }
  0x7d   :  { %v309_v42 = vmin.f32 %v307_v36, 1.0  ;;  %v306_v49 = vmin.f32 %v302_v57, %v304_v37 }
  0x7e   :  { %v263_v50 = vmul.f32 %v261_v32, %v259_v38  ;;  %v287_v51 = vmul.f32 %v285_v40, %v261_v32  ;;  %v260_v52 = vmin.f32 %v258_v41, 1.0  ;;  %v286_v58 = vmin.f32 %v284_v59, 1.0 }
  0x7f   :  { %v311_v60 = vmul.f32 %v309_v42, %v261_v32  ;;  %v308_v61 = vmax.f32 %v306_v49, 0.0 }
  0x80   :  { %v265_v62 = vsub.f32 %v630_v53, %v263_v50  ;;  %v289_v54 = vsub.f32 %v630_v53, %v287_v51  ;;  %v264_v63 = vmul.f32 %v262_v39, %v260_v52  ;;  %v288_v0 = vmul.f32 %v286_v58, %v262_v39 }
  0x81   :  { %v313_v1 = vsub.f32 %v630_v53, %v311_v60  ;;  %v310_v2 = vmin.f32 %v308_v61, 1.0 }
  0x82   :  { %v267_v3 = vmax.f32 %v265_v62, 0.0  ;;  %v291_v4 = vmax.f32 %v289_v54, 0.0  ;;  %v266_v5 = vsub.f32 %v634_v55, %v264_v63  ;;  %v290_v56 = vsub.f32 %v634_v55, %v288_v0 }
  0x83   :  { %v315_v6 = vmax.f32 %v313_v1, 0.0  ;;  %v312_v7 = vmul.f32 %v310_v2, %v262_v39 }
  0x84   :  { %v269_v8 = vmin.f32 %v267_v3, 1.0  ;;  %v293_v9 = vmin.f32 %v291_v4, 1.0  ;;  %v268_v10 = vmax.f32 %v266_v5, 0.0  ;;  %v292_v11 = vmax.f32 %v290_v56, 0.0 }
  0x85   :  { %v317_v12 = vmin.f32 %v315_v6, 1.0  ;;  %v314_v13 = vsub.f32 %v634_v55, %v312_v7 }
  0x86   :  { %v319_v53 = vmul.f32 %v269_v8, %v565_v20  ;;  %v327_v15 = vmul.f32 %v293_v9, %v565_v20  ;;  %v270_v16 = vmin.f32 %v268_v10, 1.0  ;;  %v294_v17 = vmin.f32 %v292_v11, 1.0 }
  0x87   :  { %v335_v18 = vmul.f32 %v317_v12, %v565_v20  ;;  %v316_v19 = vmax.f32 %v314_v13, 0.0 }
  0x88   :  { %v321_v21 = vadd.f32 %v319_v53, %v567_v27  ;;  %v329_v22 = vadd.f32 %v327_v15, %v567_v27  ;;  %v320_v23 = vmul.f32 %v270_v16, %v565_v20  ;;  %v328_v24 = vmul.f32 %v294_v17, %v565_v20 }
  0x89   :  { %v337_v55 = vadd.f32 %v335_v18, %v567_v27  ;;  %v318_v25 = vmin.f32 %v316_v19, 1.0 }
  0x8a   :  { %v323_v26 = vmax.f32 %v321_v21, 0.0  ;;  %v331_v29 = vmax.f32 %v329_v22, 0.0  ;;  %v322_v30 = vadd.f32 %v320_v23, %v567_v27  ;;  %v330_v57 = vadd.f32 %v328_v24, %v567_v27 }
  0x8b   :  { %v339_v31 = vmax.f32 %v337_v55, 0.0  ;;  %v336_v32 = vmul.f32 %v318_v25, %v565_v20 }
  0x8c   :  { %v325_v33 = vmin.f32 %v323_v26, 1.0  ;;  %v333_v34 = vmin.f32 %v331_v29, 1.0  ;;  %v324_v35 = vmax.f32 %v322_v30, 0.0  ;;  %v332_v36 = vmax.f32 %v330_v57, 0.0 }
  0x8d   :  { %v341_v37 = vmin.f32 %v339_v31, 1.0  ;;  %v338_v38 = vadd.f32 %v336_v32, %v567_v27 }
  0x8e   :  { %v346_v39 = vsel %vm733_vm7, %v325_v33, %v269_v8  ;;  %v348_v40 = vsel %vm733_vm7, %v333_v34, %v293_v9  ;;  %v326_v41 = vmin.f32 %v324_v35, 1.0  ;;  %v334_v59 = vmin.f32 %v332_v36, 1.0 }
  0x8f   :  { %353 = vst.msk [vmem:[#allocation5] sm:$0xff] %vm352_vm8, %v346_v39  ;;  %356 = vst.msk [vmem:[#allocation5 + $0x10] sm:$0xff] %vm352_vm8, %v348_v40  ;;  %v350_v42 = vsel %vm733_vm7, %v341_v37, %v317_v12  ;;  %v340_v49 = vmax.f32 %v338_v38, 0.0 }
  0x90   :  { %359 = vst.msk [vmem:[#allocation5 + $0x20] sm:$0xff] %vm352_vm8, %v350_v42  ;;  %v347_v50 = vsel %vm733_vm7, %v326_v41, %v270_v16  ;;  %v349_v51 = vsel %vm733_vm7, %v334_v59, %v294_v17 }
  0x91   :  { %v342_v52 = vmin.f32 %v340_v49, 1.0  ;;  %354 = vst.msk [vmem:[#allocation5 + $0x8] sm:$0xff] %vm352_vm8, %v347_v50  ;;  %357 = vst.msk [vmem:[#allocation5 + $0x18] sm:$0xff] %vm352_vm8, %v349_v51 }
  0x93   :  { %v351_v58 = vsel %vm733_vm7, %v342_v52, %v318_v25 }
  0x94   :  { %360 = vst.msk [vmem:[#allocation5 + $0x28] sm:$0xff] %vm352_vm8, %v351_v58 }
  0x95 PF:  { %p436_p1 = scmp.gt.s32.totalorder %s535_s22, 0 }
  0x96   :  { %v365_v60 = vmul.f32 (!%p436_p1), %v608_v43, %v565_v20  ;;  %v366_v61 = vmul.f32 (!%p436_p1), %v614_v46, %v565_v20  ;;  %v373_v62 = vmul.f32 (!%p436_p1), %v610_v44, %v565_v20  ;;  %v374_v54 = vmul.f32 (!%p436_p1), %v616_v47, %v565_v20 }
  0x97   :  { %364 = sbr.rel (%p436_p1) target bundleno = 166 (0xa6), region = 13  ;;  %v381_v63 = vmul.f32 (!%p436_p1), %v612_v45, %v565_v20  ;;  %v382_v0 = vmul.f32 (!%p436_p1), %v618_v48, %v565_v20  ;;  %vm398_vm10 = vcmask (!%p436_p1), 130048  }
  0x98   :  { %v367_v1 = vadd.f32 (!%p436_p1), %v365_v60, %v567_v27  ;;  %v368_v3 = vadd.f32 (!%p436_p1), %v366_v61, %v567_v27  ;;  %v375_v4 = vadd.f32 (!%p436_p1), %v373_v62, %v567_v27  ;;  %v376_v5 = vadd.f32 (!%p436_p1), %v374_v54, %v567_v27 }
  0x99   :  { %v383_v56 = vadd.f32 (!%p436_p1), %v381_v63, %v567_v27  ;;  %v384_v6 = vadd.f32 (!%p436_p1), %v382_v0, %v567_v27 }
  0x9a   :  { %v369_v7 = vmax.f32 (!%p436_p1), %v367_v1, 0.0  ;;  %v370_v8 = vmax.f32 (!%p436_p1), %v368_v3, 0.0  ;;  %v377_v9 = vmax.f32 (!%p436_p1), %v375_v4, 0.0  ;;  %v378_v20 = vmax.f32 (!%p436_p1), %v376_v5, 0.0 }
  0x9b   :  { %v385_v11 = vmax.f32 (!%p436_p1), %v383_v56, 0.0  ;;  %v386_v12 = vmax.f32 (!%p436_p1), %v384_v6, 0.0 }
  0x9c   :  { %v371_v13 = vmin.f32 (!%p436_p1), %v369_v7, 1.0  ;;  %v372_v53 = vmin.f32 (!%p436_p1), %v370_v8, 1.0  ;;  %v379_v14 = vmin.f32 (!%p436_p1), %v377_v9, 1.0  ;;  %v380_v15 = vmin.f32 (!%p436_p1), %v378_v20, 1.0 }
  0x9d   :  { %v387_v16 = vmin.f32 (!%p436_p1), %v385_v11, 1.0  ;;  %v388_v17 = vmin.f32 (!%p436_p1), %v386_v12, 1.0 }
  0x9e   :  { %s389_s0 = scalar_select %p30_p11, 1, 0 }
  0xa0   :  { %v390_v2 = vstv %s389_s0 }
  0xa1   :  { %vm780_vm9 = vcmp.eq.s32.totalorder %v390_v2, 1 }
  0xa2   :  { %v392_v27 = vsel %vm780_vm9, %v371_v13, %v608_v43  ;;  %v393_v18 = vsel %vm780_vm9, %v372_v53, %v614_v46  ;;  %v394_v19 = vsel %vm780_vm9, %v379_v14, %v610_v44  ;;  %v395_v21 = vsel %vm780_vm9, %v380_v15, %v616_v47 }
  0xa3   :  { %399 = vst.msk [vmem:[#allocation5] sm:$0xff] %vm398_vm10, %v392_v27  ;;  %400 = vst.msk [vmem:[#allocation5 + $0x8] sm:$0xff] %vm398_vm10, %v393_v18  ;;  %v396_v43 = vsel %vm780_vm9, %v387_v16, %v612_v45  ;;  %v397_v46 = vsel %vm780_vm9, %v388_v17, %v618_v48 }
  0xa4   :  { %402 = vst.msk [vmem:[#allocation5 + $0x10] sm:$0xff] %vm398_vm10, %v394_v19  ;;  %403 = vst.msk [vmem:[#allocation5 + $0x18] sm:$0xff] %vm398_vm10, %v395_v21 }
  0xa5   :  { %405 = vst.msk [vmem:[#allocation5 + $0x20] sm:$0xff] %vm398_vm10, %v396_v43  ;;  %406 = vst.msk [vmem:[#allocation5 + $0x28] sm:$0xff] %vm398_vm10, %v397_v46 }
  0xa6 PF:  { %s504_s1 = smov [#allocation5]  }
  0xa7   :  { %s412_s21 = sshll.u32 %s504_s1, 4  ;;  %s413_s21 = int_to_ptr.vmem [resolvable:$true] %s412_s21 }
  0xa8   :  { %s475_s22 = scalar_lea.vmem %s413_s21, 768  ;;  %p480_p3 = scmp.lt.s32.totalorder %s413_s21, %s413_s21 }
  0xa9   :  { %p476_p2 = scmp.ne.s32.totalorder %s413_s21, %s475_s22  ;;  %p481_p4 = scmp.lt.s32.totalorder %s475_s22, %s475_s22 }
  0xab   :  { %p482_p5 = por %p481_p4, %p480_p3 }
  0xad   :  { %p483_p6 = pnand %p482_p5, %p476_p2 }
  0xaf   :  { %486 = shalt.err (!%p483_p6)
}
  0xb0   :  { %s487_s25 = scalar_lea.hbm %s822_s3, 768 }
  0xb1   :  { %p488_p7 = scmp.ne.s32.totalorder %s822_s3, %s487_s25  ;;  %p491_p8 = scmp.lt.u32.totalorder %s487_s25, %s822_s3 }
  0xb3   :  { %p493_p9 = pnand %p491_p8, %p488_p7 }
  0xb5   :  { %496 = shalt.err (!%p493_p9)
}
  0xb6   :  { %s505_s30 = smov 128   ;;  %s506_s4 = smov 8  }
  0xb7   :  { %418 = dma.vmem_to_hbm [thread:$0]  %s413_s21, 768, %s822_s3, [#allocation6], %s505_s30, %s505_s30, %s506_s4  }
  0xb8   :  { %499 = dma.done.wait [#allocation6], 768  }
  0xb9   :  { %500 = vsyncadd [#allocation6], 4294966528 }
  0xba   :  { %422 = vsyncpa [#allocation6], 1 }

</bundles_post_ra>
